<compile_context>
chip_gen: v7x
topology: tpu7x:2x2x1
jax: 0.10.0
libtpu: 0.0.40
codegen_flags: <defaults>
</compile_context>

<pallas_src>
import jax
import jax.numpy as jnp
from jax.experimental import pallas as pl
from jax.experimental.pallas import tpu as pltpu


def _pick_batch_tile(B, N, max_rows=2048):
    """Largest divisor of B that keeps >=2 grid steps (when B > 1) and bounds
    the per-step row count (bt * N) so activations stay comfortably in VMEM."""
    if B <= 1:
        return 1
    best = 1
    for d in range(1, B // 2 + 1):
        if B % d == 0 and d * N <= max_rows:
            best = d
    return best


# ------------------------------ JAX wrapper -------------------------------

def temporal_resnet_pointnet(x4, params, batch_tile=None):
    """x4: (B, T, N, pdim) float32 -> (B, c_dim) float32."""
    B, T, N, pd = x4.shape
    D = T * pd
    H2 = params["wpos"].shape[1]
    H = H2 // 2
    c_dim = params["wc"].shape[1]
    f32 = jnp.float32

    bt = batch_tile if batch_tile is not None else _pick_batch_tile(B, N)
    assert B % bt == 0, (B, bt)
    nbt = B // bt
    M = bt * N

    # torch: x.transpose(1, 2).view(B, N, T*pd).  Tiny array -> free XLA op;
    # lets fc_pos be a single K = T*pd matmul inside the kernel.
    x = jnp.transpose(x4, (0, 2, 1, 3)).reshape(B, N, D)

    # ---- pack weights into a handful of stacked arrays ----
    wpos, bpos = params["wpos"], params["bpos"]                     # (D,2H),(1,2H)

    blk0 = params["blocks"][0]
    blk0_w = jnp.stack([blk0["w0"], blk0["ws"]])                    # (2, 2H, H)
    blk0_w1 = blk0["w1"]                                            # (H, H)
    blk0_b = jnp.stack([blk0["b0"], blk0["b1"]])                    # (2, 1, H)

    # blocks 1..4: split fc_0 / shortcut weights into net-half and pooled-half.
    blk_w = jnp.stack([
        jnp.stack([p["w0"][:H], p["w0"][H:], p["w1"], p["ws"][:H], p["ws"][H:]])
        for p in params["blocks"][1:]])                             # (4, 5, H, H)
    blk_b = jnp.stack([jnp.stack([p["b0"], p["b1"]])
                       for p in params["blocks"][1:]])              # (4, 2, 1, H)

    wc, bc = params["wc"], params["bc"]                             # (H,c), (1,c)

    # --------------------------- Pallas kernel ----------------------------
    def kernel(x_ref, wpos_ref, bpos_ref, blk0w_ref, blk0w1_ref, blk0b_ref,
               blkw_ref, blkb_ref, wc_ref, bc_ref, out_ref):
        relu = jax.nn.relu

        # fc_pos: one (bt*N, D) @ (D, 2H) matmul (batch + time fused).
        xt = x_ref[...].reshape(M, D)
        net = jnp.dot(xt, wpos_ref[...],
                      preferred_element_type=f32) + bpos_ref[...]    # (M, 2H)

        # block_0: ResnetBlockFC(2H -> H)
        h = jnp.dot(relu(net), blk0w_ref[0],
                    preferred_element_type=f32) + blk0b_ref[0]
        dx = jnp.dot(relu(h), blk0w1_ref[...],
                     preferred_element_type=f32) + blk0b_ref[1]
        net = jnp.dot(net, blk0w_ref[1],
                      preferred_element_type=f32) + dx               # (M, H)

        # blocks 1..4: pooled-feature blocks with split weights.
        # Segmented (per-batch) max pooling; pooled contribution is a tiny
        # (bt, H) @ (H, H) matmul broadcast-added per batch element.
        for i in range(4):
            pooled = jnp.max(net.reshape(bt, N, H), axis=1)          # (bt, H)
            ph = jnp.dot(relu(pooled), blkw_ref[i, 1],
                         preferred_element_type=f32) + blkb_ref[i, 0]  # (bt, H)
            ps = jnp.dot(pooled, blkw_ref[i, 4],
                         preferred_element_type=f32)                   # (bt, H)
            h = (jnp.dot(relu(net), blkw_ref[i, 0],
                         preferred_element_type=f32).reshape(bt, N, H)
                 + ph[:, None, :]).reshape(M, H)
            dx = jnp.dot(relu(h), blkw_ref[i, 2],
                         preferred_element_type=f32) + blkb_ref[i, 1]
            net = (jnp.dot(net, blkw_ref[i, 3],
                           preferred_element_type=f32).reshape(bt, N, H)
                   + ps[:, None, :]).reshape(M, H) + dx               # (M, H)

        pooled = jnp.max(net.reshape(bt, N, H), axis=1)               # (bt, H)
        out = jnp.dot(relu(pooled), wc_ref[...],
                      preferred_element_type=f32) + bc_ref[...]       # (bt, c)
        out_ref[...] = out.reshape(1, bt, c_dim)

    # ---------------------------- pallas_call -----------------------------
    flat = [x, wpos, bpos, blk0_w, blk0_w1, blk0_b, blk_w, blk_b, wc, bc]

    def full_spec(a):
        zeros = (0,) * a.ndim
        return pl.BlockSpec(a.shape, lambda i, _z=zeros: _z)

    in_specs = ([pl.BlockSpec((bt, N, D), lambda i: (i, 0, 0))]
                + [full_spec(a) for a in flat[1:]])
    out_spec = pl.BlockSpec((1, bt, c_dim), lambda i: (i, 0, 0))

    out3 = pl.pallas_call(
        kernel,
        out_shape=jax.ShapeDtypeStruct((nbt, bt, c_dim), jnp.float32),
        grid_spec=pltpu.PrefetchScalarGridSpec(
            num_scalar_prefetch=0,
            grid=(nbt,),
            in_specs=in_specs,
            out_specs=out_spec,
        ),
        compiler_params=pltpu.CompilerParams(
            dimension_semantics=("parallel",),
            vmem_limit_bytes=32 * 1024 * 1024),
    )(*flat)
    return out3.reshape(B, c_dim)


# -------------------------- pure-JAX reference ----------------------------

def reference_forward(x4, params):
    B, T, N, pd = x4.shape
    x = jnp.transpose(x4, (0, 2, 1, 3)).reshape(B, N, T * pd)

    def block(h, p):
        net = jax.nn.relu(h) @ p["w0"] + p["b0"]
        dx = jax.nn.relu(net) @ p["w1"] + p["b1"]
        return h @ p["ws"] + dx

    net = x @ params["wpos"] + params["bpos"]
    net = block(net, params["blocks"][0])
    for p in params["blocks"][1:]:
        pooled = jnp.max(net, axis=1, keepdims=True)
        net = jnp.concatenate([net, jnp.broadcast_to(pooled, net.shape)], axis=-1)
        net = block(net, p)
    net = jnp.max(net, axis=1)
    return jax.nn.relu(net) @ params["wc"] + params["bc"][0]


# ------------------------- deterministic params ---------------------------

def make_params(key, D, H, c_dim):
    keys = iter(jax.random.split(key, 64))

    def linear(k_in, k_out):
        w = jax.random.normal(next(keys), (k_in, k_out), jnp.float32) / jnp.sqrt(
            jnp.float32(k_in))
        b = jax.random.normal(next(keys), (1, k_out), jnp.float32) * 0.01
        return w, b

    wpos, bpos = linear(D, 2 * H)
    blocks = []
    for _ in range(5):
        w0, b0 = linear(2 * H, H)
        w1, b1 = linear(H, H)
        ws = jax.random.normal(next(keys), (2 * H, H), jnp.float32) / jnp.sqrt(
            jnp.float32(2 * H))
        blocks.append(dict(w0=w0, b0=b0, w1=w1, b1=b1, ws=ws))
    wc, bc = linear(H, c_dim)
    return dict(wpos=wpos, bpos=bpos, blocks=blocks, wc=wc, bc=bc)


# --------------------------------- main ------------------------------------

if __name__ == "__main__":
    B, T, N, PDIM = 2, 4, 16, 3          # sequence length T=4, 16 points
    HIDDEN, C_DIM = 32, 16
    D = T * PDIM                          # concatenated per-point dim (= 12)

    key = jax.random.PRNGKey(0)
    kx, kp = jax.random.split(key)
    x4 = jax.random.normal(kx, (B, T, N, PDIM), jnp.float32)
    params = make_params(kp, D, HIDDEN, C_DIM)

    out = temporal_resnet_pointnet(x4, params)
    out = jax.block_until_ready(out)

    ref = reference_forward(x4, params)
    assert out.shape == (B, C_DIM), out.shape
    assert jnp.allclose(out, ref, rtol=1e-4, atol=1e-4), (
        float(jnp.max(jnp.abs(out - ref))))

    print("KERNEL_OK")
</pallas_src>

<mosaic_0001>
module attributes {stable_mosaic.version = 11 : i64} {
  func.func @kernel(%arg0: i32, %arg1: memref<1x16x12xf32, #tpu.memory_space<vmem>>, %arg2: memref<12x64xf32, #tpu.memory_space<vmem>>, %arg3: memref<1x64xf32, #tpu.memory_space<vmem>>, %arg4: memref<2x64x32xf32, #tpu.memory_space<vmem>>, %arg5: memref<32x32xf32, #tpu.memory_space<vmem>>, %arg6: memref<2x1x32xf32, #tpu.memory_space<vmem>>, %arg7: memref<4x5x32x32xf32, #tpu.memory_space<vmem>>, %arg8: memref<4x2x1x32xf32, #tpu.memory_space<vmem>>, %arg9: memref<32x16xf32, #tpu.memory_space<vmem>>, %arg10: memref<1x16xf32, #tpu.memory_space<vmem>>, %arg11: memref<1x1x16xf32, #tpu.memory_space<vmem>>) attributes {dimension_semantics = [#tpu.dimension_semantics<parallel>], iteration_bounds = array<i64: 2>, scalar_prefetch = 0 : i64, scratch_operands = 0 : i64, tpu.core_type = #tpu.core_type<tc>, window_params = [{transform_indices = @transform_0, window_bounds = array<i64: 1, 16, 12>}, {pipeline_mode = #tpu.pipeline_mode<synchronous>, transform_indices = @transform_1, window_bounds = array<i64: 12, 64>}, {pipeline_mode = #tpu.pipeline_mode<synchronous>, transform_indices = @transform_2, window_bounds = array<i64: 1, 64>}, {pipeline_mode = #tpu.pipeline_mode<synchronous>, transform_indices = @transform_3, window_bounds = array<i64: 2, 64, 32>}, {pipeline_mode = #tpu.pipeline_mode<synchronous>, transform_indices = @transform_4, window_bounds = array<i64: 32, 32>}, {pipeline_mode = #tpu.pipeline_mode<synchronous>, transform_indices = @transform_5, window_bounds = array<i64: 2, 1, 32>}, {pipeline_mode = #tpu.pipeline_mode<synchronous>, transform_indices = @transform_6, window_bounds = array<i64: 4, 5, 32, 32>}, {pipeline_mode = #tpu.pipeline_mode<synchronous>, transform_indices = @transform_7, window_bounds = array<i64: 4, 2, 1, 32>}, {pipeline_mode = #tpu.pipeline_mode<synchronous>, transform_indices = @transform_8, window_bounds = array<i64: 32, 16>}, {pipeline_mode = #tpu.pipeline_mode<synchronous>, transform_indices = @transform_9, window_bounds = array<i64: 1, 16>}, {transform_indices = @transform_10, window_bounds = array<i64: 1, 1, 16>}]} {
    %c0 = arith.constant 0 : index
    %c0_0 = arith.constant 0 : index
    %c0_1 = arith.constant 0 : index
    %0 = vector.load %arg1[%c0, %c0_0, %c0_1] : memref<1x16x12xf32, #tpu.memory_space<vmem>>, vector<1x16x12xf32>
    %1 = vector.shape_cast %0 : vector<1x16x12xf32> to vector<16x12xf32>
    %c0_2 = arith.constant 0 : index
    %c0_3 = arith.constant 0 : index
    %2 = vector.load %arg2[%c0_2, %c0_3] : memref<12x64xf32, #tpu.memory_space<vmem>>, vector<12x64xf32>
    %cst = arith.constant dense<0.000000e+00> : vector<16x64xf32>
    %3 = tpu.matmul %1, %2, %cst {dimension_numbers = #tpu.dot_dimension_numbers<[1], [0], [0], [1], [0, 0, 1, 1], [], []>} : vector<16x12xf32>, vector<12x64xf32>, vector<16x64xf32> -> vector<16x64xf32>
    %c0_4 = arith.constant 0 : index
    %c0_5 = arith.constant 0 : index
    %4 = vector.load %arg3[%c0_4, %c0_5] : memref<1x64xf32, #tpu.memory_space<vmem>>, vector<1x64xf32>
    %5 = vector.broadcast %4 : vector<1x64xf32> to vector<16x64xf32>
    %6 = arith.addf %3, %5 : vector<16x64xf32>
    %cst_6 = arith.constant 0.000000e+00 : f32
    %7 = vector.broadcast %cst_6 : f32 to vector<16x64xf32>
    %8 = arith.maximumf %6, %7 : vector<16x64xf32>
    %c0_7 = arith.constant 0 : index
    %c0_8 = arith.constant 0 : index
    %c0_9 = arith.constant 0 : index
    %9 = vector.load %arg4[%c0_7, %c0_8, %c0_9] : memref<2x64x32xf32, #tpu.memory_space<vmem>>, vector<1x64x32xf32>
    %10 = vector.shape_cast %9 : vector<1x64x32xf32> to vector<64x32xf32>
    %cst_10 = arith.constant dense<0.000000e+00> : vector<16x32xf32>
    %11 = tpu.matmul %8, %10, %cst_10 {dimension_numbers = #tpu.dot_dimension_numbers<[1], [0], [0], [1], [0, 0, 1, 1], [], []>} : vector<16x64xf32>, vector<64x32xf32>, vector<16x32xf32> -> vector<16x32xf32>
    %c0_11 = arith.constant 0 : index
    %c0_12 = arith.constant 0 : index
    %c0_13 = arith.constant 0 : index
    %12 = vector.load %arg6[%c0_11, %c0_12, %c0_13] : memref<2x1x32xf32, #tpu.memory_space<vmem>>, vector<1x1x32xf32>
    %13 = vector.shape_cast %12 : vector<1x1x32xf32> to vector<1x32xf32>
    %14 = vector.broadcast %13 : vector<1x32xf32> to vector<16x32xf32>
    %15 = arith.addf %11, %14 : vector<16x32xf32>
    %cst_14 = arith.constant 0.000000e+00 : f32
    %16 = vector.broadcast %cst_14 : f32 to vector<16x32xf32>
    %17 = arith.maximumf %15, %16 : vector<16x32xf32>
    %c0_15 = arith.constant 0 : index
    %c0_16 = arith.constant 0 : index
    %18 = vector.load %arg5[%c0_15, %c0_16] : memref<32x32xf32, #tpu.memory_space<vmem>>, vector<32x32xf32>
    %cst_17 = arith.constant dense<0.000000e+00> : vector<16x32xf32>
    %19 = tpu.matmul %17, %18, %cst_17 {dimension_numbers = #tpu.dot_dimension_numbers<[1], [0], [0], [1], [0, 0, 1, 1], [], []>} : vector<16x32xf32>, vector<32x32xf32>, vector<16x32xf32> -> vector<16x32xf32>
    %c1 = arith.constant 1 : index
    %c0_18 = arith.constant 0 : index
    %c0_19 = arith.constant 0 : index
    %20 = vector.load %arg6[%c1, %c0_18, %c0_19] : memref<2x1x32xf32, #tpu.memory_space<vmem>>, vector<1x1x32xf32>
    %21 = vector.shape_cast %20 : vector<1x1x32xf32> to vector<1x32xf32>
    %22 = vector.broadcast %21 : vector<1x32xf32> to vector<16x32xf32>
    %23 = arith.addf %19, %22 : vector<16x32xf32>
    %c1_20 = arith.constant 1 : index
    %c0_21 = arith.constant 0 : index
    %c0_22 = arith.constant 0 : index
    %24 = vector.load %arg4[%c1_20, %c0_21, %c0_22] : memref<2x64x32xf32, #tpu.memory_space<vmem>>, vector<1x64x32xf32>
    %25 = vector.shape_cast %24 : vector<1x64x32xf32> to vector<64x32xf32>
    %cst_23 = arith.constant dense<0.000000e+00> : vector<16x32xf32>
    %26 = tpu.matmul %6, %25, %cst_23 {dimension_numbers = #tpu.dot_dimension_numbers<[1], [0], [0], [1], [0, 0, 1, 1], [], []>} : vector<16x64xf32>, vector<64x32xf32>, vector<16x32xf32> -> vector<16x32xf32>
    %27 = arith.addf %26, %23 : vector<16x32xf32>
    %28 = vector.shape_cast %27 : vector<16x32xf32> to vector<1x16x32xf32>
    %cst_24 = arith.constant dense<0xFF800000> : vector<1x32xf32>
    %29 = vector.multi_reduction <maximumf>, %28, %cst_24 [1] : vector<1x16x32xf32> to vector<1x32xf32>
    %cst_25 = arith.constant 0.000000e+00 : f32
    %30 = vector.broadcast %cst_25 : f32 to vector<1x32xf32>
    %31 = arith.maximumf %29, %30 : vector<1x32xf32>
    %c0_26 = arith.constant 0 : index
    %c1_27 = arith.constant 1 : index
    %c0_28 = arith.constant 0 : index
    %c0_29 = arith.constant 0 : index
    %32 = vector.load %arg7[%c0_26, %c1_27, %c0_28, %c0_29] : memref<4x5x32x32xf32, #tpu.memory_space<vmem>>, vector<1x1x32x32xf32>
    %33 = vector.shape_cast %32 : vector<1x1x32x32xf32> to vector<32x32xf32>
    %cst_30 = arith.constant dense<0.000000e+00> : vector<1x32xf32>
    %34 = tpu.matmul %31, %33, %cst_30 {dimension_numbers = #tpu.dot_dimension_numbers<[1], [0], [0], [1], [0, 0, 1, 1], [], []>} : vector<1x32xf32>, vector<32x32xf32>, vector<1x32xf32> -> vector<1x32xf32>
    %c0_31 = arith.constant 0 : index
    %c0_32 = arith.constant 0 : index
    %c0_33 = arith.constant 0 : index
    %c0_34 = arith.constant 0 : index
    %35 = vector.load %arg8[%c0_31, %c0_32, %c0_33, %c0_34] : memref<4x2x1x32xf32, #tpu.memory_space<vmem>>, vector<1x1x1x32xf32>
    %36 = vector.shape_cast %35 : vector<1x1x1x32xf32> to vector<1x32xf32>
    %37 = arith.addf %34, %36 : vector<1x32xf32>
    %c0_35 = arith.constant 0 : index
    %c4 = arith.constant 4 : index
    %c0_36 = arith.constant 0 : index
    %c0_37 = arith.constant 0 : index
    %38 = vector.load %arg7[%c0_35, %c4, %c0_36, %c0_37] : memref<4x5x32x32xf32, #tpu.memory_space<vmem>>, vector<1x1x32x32xf32>
    %39 = vector.shape_cast %38 : vector<1x1x32x32xf32> to vector<32x32xf32>
    %cst_38 = arith.constant dense<0.000000e+00> : vector<1x32xf32>
    %40 = tpu.matmul %29, %39, %cst_38 {dimension_numbers = #tpu.dot_dimension_numbers<[1], [0], [0], [1], [0, 0, 1, 1], [], []>} : vector<1x32xf32>, vector<32x32xf32>, vector<1x32xf32> -> vector<1x32xf32>
    %cst_39 = arith.constant 0.000000e+00 : f32
    %41 = vector.broadcast %cst_39 : f32 to vector<16x32xf32>
    %42 = arith.maximumf %27, %41 : vector<16x32xf32>
    %c0_40 = arith.constant 0 : index
    %c0_41 = arith.constant 0 : index
    %c0_42 = arith.constant 0 : index
    %c0_43 = arith.constant 0 : index
    %43 = vector.load %arg7[%c0_40, %c0_41, %c0_42, %c0_43] : memref<4x5x32x32xf32, #tpu.memory_space<vmem>>, vector<1x1x32x32xf32>
    %44 = vector.shape_cast %43 : vector<1x1x32x32xf32> to vector<32x32xf32>
    %cst_44 = arith.constant dense<0.000000e+00> : vector<16x32xf32>
    %45 = tpu.matmul %42, %44, %cst_44 {dimension_numbers = #tpu.dot_dimension_numbers<[1], [0], [0], [1], [0, 0, 1, 1], [], []>} : vector<16x32xf32>, vector<32x32xf32>, vector<16x32xf32> -> vector<16x32xf32>
    %46 = vector.shape_cast %45 : vector<16x32xf32> to vector<1x16x32xf32>
    %47 = vector.shape_cast %37 : vector<1x32xf32> to vector<1x1x32xf32>
    %48 = vector.broadcast %47 : vector<1x1x32xf32> to vector<1x16x32xf32>
    %49 = arith.addf %46, %48 : vector<1x16x32xf32>
    %50 = vector.shape_cast %49 : vector<1x16x32xf32> to vector<16x32xf32>
    %cst_45 = arith.constant 0.000000e+00 : f32
    %51 = vector.broadcast %cst_45 : f32 to vector<16x32xf32>
    %52 = arith.maximumf %50, %51 : vector<16x32xf32>
    %c0_46 = arith.constant 0 : index
    %c2 = arith.constant 2 : index
    %c0_47 = arith.constant 0 : index
    %c0_48 = arith.constant 0 : index
    %53 = vector.load %arg7[%c0_46, %c2, %c0_47, %c0_48] : memref<4x5x32x32xf32, #tpu.memory_space<vmem>>, vector<1x1x32x32xf32>
    %54 = vector.shape_cast %53 : vector<1x1x32x32xf32> to vector<32x32xf32>
    %cst_49 = arith.constant dense<0.000000e+00> : vector<16x32xf32>
    %55 = tpu.matmul %52, %54, %cst_49 {dimension_numbers = #tpu.dot_dimension_numbers<[1], [0], [0], [1], [0, 0, 1, 1], [], []>} : vector<16x32xf32>, vector<32x32xf32>, vector<16x32xf32> -> vector<16x32xf32>
    %c0_50 = arith.constant 0 : index
    %c1_51 = arith.constant 1 : index
    %c0_52 = arith.constant 0 : index
    %c0_53 = arith.constant 0 : index
    %56 = vector.load %arg8[%c0_50, %c1_51, %c0_52, %c0_53] : memref<4x2x1x32xf32, #tpu.memory_space<vmem>>, vector<1x1x1x32xf32>
    %57 = vector.shape_cast %56 : vector<1x1x1x32xf32> to vector<1x32xf32>
    %58 = vector.broadcast %57 : vector<1x32xf32> to vector<16x32xf32>
    %59 = arith.addf %55, %58 : vector<16x32xf32>
    %c0_54 = arith.constant 0 : index
    %c3 = arith.constant 3 : index
    %c0_55 = arith.constant 0 : index
    %c0_56 = arith.constant 0 : index
    %60 = vector.load %arg7[%c0_54, %c3, %c0_55, %c0_56] : memref<4x5x32x32xf32, #tpu.memory_space<vmem>>, vector<1x1x32x32xf32>
    %61 = vector.shape_cast %60 : vector<1x1x32x32xf32> to vector<32x32xf32>
    %cst_57 = arith.constant dense<0.000000e+00> : vector<16x32xf32>
    %62 = tpu.matmul %27, %61, %cst_57 {dimension_numbers = #tpu.dot_dimension_numbers<[1], [0], [0], [1], [0, 0, 1, 1], [], []>} : vector<16x32xf32>, vector<32x32xf32>, vector<16x32xf32> -> vector<16x32xf32>
    %63 = vector.shape_cast %62 : vector<16x32xf32> to vector<1x16x32xf32>
    %64 = vector.shape_cast %40 : vector<1x32xf32> to vector<1x1x32xf32>
    %65 = vector.broadcast %64 : vector<1x1x32xf32> to vector<1x16x32xf32>
    %66 = arith.addf %63, %65 : vector<1x16x32xf32>
    %67 = vector.shape_cast %66 : vector<1x16x32xf32> to vector<16x32xf32>
    %68 = arith.addf %67, %59 : vector<16x32xf32>
    %69 = vector.shape_cast %68 : vector<16x32xf32> to vector<1x16x32xf32>
    %cst_58 = arith.constant dense<0xFF800000> : vector<1x32xf32>
    %70 = vector.multi_reduction <maximumf>, %69, %cst_58 [1] : vector<1x16x32xf32> to vector<1x32xf32>
    %cst_59 = arith.constant 0.000000e+00 : f32
    %71 = vector.broadcast %cst_59 : f32 to vector<1x32xf32>
    %72 = arith.maximumf %70, %71 : vector<1x32xf32>
    %c1_60 = arith.constant 1 : index
    %c1_61 = arith.constant 1 : index
    %c0_62 = arith.constant 0 : index
    %c0_63 = arith.constant 0 : index
    %73 = vector.load %arg7[%c1_60, %c1_61, %c0_62, %c0_63] : memref<4x5x32x32xf32, #tpu.memory_space<vmem>>, vector<1x1x32x32xf32>
    %74 = vector.shape_cast %73 : vector<1x1x32x32xf32> to vector<32x32xf32>
    %cst_64 = arith.constant dense<0.000000e+00> : vector<1x32xf32>
    %75 = tpu.matmul %72, %74, %cst_64 {dimension_numbers = #tpu.dot_dimension_numbers<[1], [0], [0], [1], [0, 0, 1, 1], [], []>} : vector<1x32xf32>, vector<32x32xf32>, vector<1x32xf32> -> vector<1x32xf32>
    %c1_65 = arith.constant 1 : index
    %c0_66 = arith.constant 0 : index
    %c0_67 = arith.constant 0 : index
    %c0_68 = arith.constant 0 : index
    %76 = vector.load %arg8[%c1_65, %c0_66, %c0_67, %c0_68] : memref<4x2x1x32xf32, #tpu.memory_space<vmem>>, vector<1x1x1x32xf32>
    %77 = vector.shape_cast %76 : vector<1x1x1x32xf32> to vector<1x32xf32>
    %78 = arith.addf %75, %77 : vector<1x32xf32>
    %c1_69 = arith.constant 1 : index
    %c4_70 = arith.constant 4 : index
    %c0_71 = arith.constant 0 : index
    %c0_72 = arith.constant 0 : index
    %79 = vector.load %arg7[%c1_69, %c4_70, %c0_71, %c0_72] : memref<4x5x32x32xf32, #tpu.memory_space<vmem>>, vector<1x1x32x32xf32>
    %80 = vector.shape_cast %79 : vector<1x1x32x32xf32> to vector<32x32xf32>
    %cst_73 = arith.constant dense<0.000000e+00> : vector<1x32xf32>
    %81 = tpu.matmul %70, %80, %cst_73 {dimension_numbers = #tpu.dot_dimension_numbers<[1], [0], [0], [1], [0, 0, 1, 1], [], []>} : vector<1x32xf32>, vector<32x32xf32>, vector<1x32xf32> -> vector<1x32xf32>
    %cst_74 = arith.constant 0.000000e+00 : f32
    %82 = vector.broadcast %cst_74 : f32 to vector<16x32xf32>
    %83 = arith.maximumf %68, %82 : vector<16x32xf32>
    %c1_75 = arith.constant 1 : index
    %c0_76 = arith.constant 0 : index
    %c0_77 = arith.constant 0 : index
    %c0_78 = arith.constant 0 : index
    %84 = vector.load %arg7[%c1_75, %c0_76, %c0_77, %c0_78] : memref<4x5x32x32xf32, #tpu.memory_space<vmem>>, vector<1x1x32x32xf32>
    %85 = vector.shape_cast %84 : vector<1x1x32x32xf32> to vector<32x32xf32>
    %cst_79 = arith.constant dense<0.000000e+00> : vector<16x32xf32>
    %86 = tpu.matmul %83, %85, %cst_79 {dimension_numbers = #tpu.dot_dimension_numbers<[1], [0], [0], [1], [0, 0, 1, 1], [], []>} : vector<16x32xf32>, vector<32x32xf32>, vector<16x32xf32> -> vector<16x32xf32>
    %87 = vector.shape_cast %86 : vector<16x32xf32> to vector<1x16x32xf32>
    %88 = vector.shape_cast %78 : vector<1x32xf32> to vector<1x1x32xf32>
    %89 = vector.broadcast %88 : vector<1x1x32xf32> to vector<1x16x32xf32>
    %90 = arith.addf %87, %89 : vector<1x16x32xf32>
    %91 = vector.shape_cast %90 : vector<1x16x32xf32> to vector<16x32xf32>
    %cst_80 = arith.constant 0.000000e+00 : f32
    %92 = vector.broadcast %cst_80 : f32 to vector<16x32xf32>
    %93 = arith.maximumf %91, %92 : vector<16x32xf32>
    %c1_81 = arith.constant 1 : index
    %c2_82 = arith.constant 2 : index
    %c0_83 = arith.constant 0 : index
    %c0_84 = arith.constant 0 : index
    %94 = vector.load %arg7[%c1_81, %c2_82, %c0_83, %c0_84] : memref<4x5x32x32xf32, #tpu.memory_space<vmem>>, vector<1x1x32x32xf32>
    %95 = vector.shape_cast %94 : vector<1x1x32x32xf32> to vector<32x32xf32>
    %cst_85 = arith.constant dense<0.000000e+00> : vector<16x32xf32>
    %96 = tpu.matmul %93, %95, %cst_85 {dimension_numbers = #tpu.dot_dimension_numbers<[1], [0], [0], [1], [0, 0, 1, 1], [], []>} : vector<16x32xf32>, vector<32x32xf32>, vector<16x32xf32> -> vector<16x32xf32>
    %c1_86 = arith.constant 1 : index
    %c1_87 = arith.constant 1 : index
    %c0_88 = arith.constant 0 : index
    %c0_89 = arith.constant 0 : index
    %97 = vector.load %arg8[%c1_86, %c1_87, %c0_88, %c0_89] : memref<4x2x1x32xf32, #tpu.memory_space<vmem>>, vector<1x1x1x32xf32>
    %98 = vector.shape_cast %97 : vector<1x1x1x32xf32> to vector<1x32xf32>
    %99 = vector.broadcast %98 : vector<1x32xf32> to vector<16x32xf32>
    %100 = arith.addf %96, %99 : vector<16x32xf32>
    %c1_90 = arith.constant 1 : index
    %c3_91 = arith.constant 3 : index
    %c0_92 = arith.constant 0 : index
    %c0_93 = arith.constant 0 : index
    %101 = vector.load %arg7[%c1_90, %c3_91, %c0_92, %c0_93] : memref<4x5x32x32xf32, #tpu.memory_space<vmem>>, vector<1x1x32x32xf32>
    %102 = vector.shape_cast %101 : vector<1x1x32x32xf32> to vector<32x32xf32>
    %cst_94 = arith.constant dense<0.000000e+00> : vector<16x32xf32>
    %103 = tpu.matmul %68, %102, %cst_94 {dimension_numbers = #tpu.dot_dimension_numbers<[1], [0], [0], [1], [0, 0, 1, 1], [], []>} : vector<16x32xf32>, vector<32x32xf32>, vector<16x32xf32> -> vector<16x32xf32>
    %104 = vector.shape_cast %103 : vector<16x32xf32> to vector<1x16x32xf32>
    %105 = vector.shape_cast %81 : vector<1x32xf32> to vector<1x1x32xf32>
    %106 = vector.broadcast %105 : vector<1x1x32xf32> to vector<1x16x32xf32>
    %107 = arith.addf %104, %106 : vector<1x16x32xf32>
    %108 = vector.shape_cast %107 : vector<1x16x32xf32> to vector<16x32xf32>
    %109 = arith.addf %108, %100 : vector<16x32xf32>
    %110 = vector.shape_cast %109 : vector<16x32xf32> to vector<1x16x32xf32>
    %cst_95 = arith.constant dense<0xFF800000> : vector<1x32xf32>
    %111 = vector.multi_reduction <maximumf>, %110, %cst_95 [1] : vector<1x16x32xf32> to vector<1x32xf32>
    %cst_96 = arith.constant 0.000000e+00 : f32
    %112 = vector.broadcast %cst_96 : f32 to vector<1x32xf32>
    %113 = arith.maximumf %111, %112 : vector<1x32xf32>
    %c2_97 = arith.constant 2 : index
    %c1_98 = arith.constant 1 : index
    %c0_99 = arith.constant 0 : index
    %c0_100 = arith.constant 0 : index
    %114 = vector.load %arg7[%c2_97, %c1_98, %c0_99, %c0_100] : memref<4x5x32x32xf32, #tpu.memory_space<vmem>>, vector<1x1x32x32xf32>
    %115 = vector.shape_cast %114 : vector<1x1x32x32xf32> to vector<32x32xf32>
    %cst_101 = arith.constant dense<0.000000e+00> : vector<1x32xf32>
    %116 = tpu.matmul %113, %115, %cst_101 {dimension_numbers = #tpu.dot_dimension_numbers<[1], [0], [0], [1], [0, 0, 1, 1], [], []>} : vector<1x32xf32>, vector<32x32xf32>, vector<1x32xf32> -> vector<1x32xf32>
    %c2_102 = arith.constant 2 : index
    %c0_103 = arith.constant 0 : index
    %c0_104 = arith.constant 0 : index
    %c0_105 = arith.constant 0 : index
    %117 = vector.load %arg8[%c2_102, %c0_103, %c0_104, %c0_105] : memref<4x2x1x32xf32, #tpu.memory_space<vmem>>, vector<1x1x1x32xf32>
    %118 = vector.shape_cast %117 : vector<1x1x1x32xf32> to vector<1x32xf32>
    %119 = arith.addf %116, %118 : vector<1x32xf32>
    %c2_106 = arith.constant 2 : index
    %c4_107 = arith.constant 4 : index
    %c0_108 = arith.constant 0 : index
    %c0_109 = arith.constant 0 : index
    %120 = vector.load %arg7[%c2_106, %c4_107, %c0_108, %c0_109] : memref<4x5x32x32xf32, #tpu.memory_space<vmem>>, vector<1x1x32x32xf32>
    %121 = vector.shape_cast %120 : vector<1x1x32x32xf32> to vector<32x32xf32>
    %cst_110 = arith.constant dense<0.000000e+00> : vector<1x32xf32>
    %122 = tpu.matmul %111, %121, %cst_110 {dimension_numbers = #tpu.dot_dimension_numbers<[1], [0], [0], [1], [0, 0, 1, 1], [], []>} : vector<1x32xf32>, vector<32x32xf32>, vector<1x32xf32> -> vector<1x32xf32>
    %cst_111 = arith.constant 0.000000e+00 : f32
    %123 = vector.broadcast %cst_111 : f32 to vector<16x32xf32>
    %124 = arith.maximumf %109, %123 : vector<16x32xf32>
    %c2_112 = arith.constant 2 : index
    %c0_113 = arith.constant 0 : index
    %c0_114 = arith.constant 0 : index
    %c0_115 = arith.constant 0 : index
    %125 = vector.load %arg7[%c2_112, %c0_113, %c0_114, %c0_115] : memref<4x5x32x32xf32, #tpu.memory_space<vmem>>, vector<1x1x32x32xf32>
    %126 = vector.shape_cast %125 : vector<1x1x32x32xf32> to vector<32x32xf32>
    %cst_116 = arith.constant dense<0.000000e+00> : vector<16x32xf32>
    %127 = tpu.matmul %124, %126, %cst_116 {dimension_numbers = #tpu.dot_dimension_numbers<[1], [0], [0], [1], [0, 0, 1, 1], [], []>} : vector<16x32xf32>, vector<32x32xf32>, vector<16x32xf32> -> vector<16x32xf32>
    %128 = vector.shape_cast %127 : vector<16x32xf32> to vector<1x16x32xf32>
    %129 = vector.shape_cast %119 : vector<1x32xf32> to vector<1x1x32xf32>
    %130 = vector.broadcast %129 : vector<1x1x32xf32> to vector<1x16x32xf32>
    %131 = arith.addf %128, %130 : vector<1x16x32xf32>
    %132 = vector.shape_cast %131 : vector<1x16x32xf32> to vector<16x32xf32>
    %cst_117 = arith.constant 0.000000e+00 : f32
    %133 = vector.broadcast %cst_117 : f32 to vector<16x32xf32>
    %134 = arith.maximumf %132, %133 : vector<16x32xf32>
    %c2_118 = arith.constant 2 : index
    %c2_119 = arith.constant 2 : index
    %c0_120 = arith.constant 0 : index
    %c0_121 = arith.constant 0 : index
    %135 = vector.load %arg7[%c2_118, %c2_119, %c0_120, %c0_121] : memref<4x5x32x32xf32, #tpu.memory_space<vmem>>, vector<1x1x32x32xf32>
    %136 = vector.shape_cast %135 : vector<1x1x32x32xf32> to vector<32x32xf32>
    %cst_122 = arith.constant dense<0.000000e+00> : vector<16x32xf32>
    %137 = tpu.matmul %134, %136, %cst_122 {dimension_numbers = #tpu.dot_dimension_numbers<[1], [0], [0], [1], [0, 0, 1, 1], [], []>} : vector<16x32xf32>, vector<32x32xf32>, vector<16x32xf32> -> vector<16x32xf32>
    %c2_123 = arith.constant 2 : index
    %c1_124 = arith.constant 1 : index
    %c0_125 = arith.constant 0 : index
    %c0_126 = arith.constant 0 : index
    %138 = vector.load %arg8[%c2_123, %c1_124, %c0_125, %c0_126] : memref<4x2x1x32xf32, #tpu.memory_space<vmem>>, vector<1x1x1x32xf32>
    %139 = vector.shape_cast %138 : vector<1x1x1x32xf32> to vector<1x32xf32>
    %140 = vector.broadcast %139 : vector<1x32xf32> to vector<16x32xf32>
    %141 = arith.addf %137, %140 : vector<16x32xf32>
    %c2_127 = arith.constant 2 : index
    %c3_128 = arith.constant 3 : index
    %c0_129 = arith.constant 0 : index
    %c0_130 = arith.constant 0 : index
    %142 = vector.load %arg7[%c2_127, %c3_128, %c0_129, %c0_130] : memref<4x5x32x32xf32, #tpu.memory_space<vmem>>, vector<1x1x32x32xf32>
    %143 = vector.shape_cast %142 : vector<1x1x32x32xf32> to vector<32x32xf32>
    %cst_131 = arith.constant dense<0.000000e+00> : vector<16x32xf32>
    %144 = tpu.matmul %109, %143, %cst_131 {dimension_numbers = #tpu.dot_dimension_numbers<[1], [0], [0], [1], [0, 0, 1, 1], [], []>} : vector<16x32xf32>, vector<32x32xf32>, vector<16x32xf32> -> vector<16x32xf32>
    %145 = vector.shape_cast %144 : vector<16x32xf32> to vector<1x16x32xf32>
    %146 = vector.shape_cast %122 : vector<1x32xf32> to vector<1x1x32xf32>
    %147 = vector.broadcast %146 : vector<1x1x32xf32> to vector<1x16x32xf32>
    %148 = arith.addf %145, %147 : vector<1x16x32xf32>
    %149 = vector.shape_cast %148 : vector<1x16x32xf32> to vector<16x32xf32>
    %150 = arith.addf %149, %141 : vector<16x32xf32>
    %151 = vector.shape_cast %150 : vector<16x32xf32> to vector<1x16x32xf32>
    %cst_132 = arith.constant dense<0xFF800000> : vector<1x32xf32>
    %152 = vector.multi_reduction <maximumf>, %151, %cst_132 [1] : vector<1x16x32xf32> to vector<1x32xf32>
    %cst_133 = arith.constant 0.000000e+00 : f32
    %153 = vector.broadcast %cst_133 : f32 to vector<1x32xf32>
    %154 = arith.maximumf %152, %153 : vector<1x32xf32>
    %c3_134 = arith.constant 3 : index
    %c1_135 = arith.constant 1 : index
    %c0_136 = arith.constant 0 : index
    %c0_137 = arith.constant 0 : index
    %155 = vector.load %arg7[%c3_134, %c1_135, %c0_136, %c0_137] : memref<4x5x32x32xf32, #tpu.memory_space<vmem>>, vector<1x1x32x32xf32>
    %156 = vector.shape_cast %155 : vector<1x1x32x32xf32> to vector<32x32xf32>
    %cst_138 = arith.constant dense<0.000000e+00> : vector<1x32xf32>
    %157 = tpu.matmul %154, %156, %cst_138 {dimension_numbers = #tpu.dot_dimension_numbers<[1], [0], [0], [1], [0, 0, 1, 1], [], []>} : vector<1x32xf32>, vector<32x32xf32>, vector<1x32xf32> -> vector<1x32xf32>
    %c3_139 = arith.constant 3 : index
    %c0_140 = arith.constant 0 : index
    %c0_141 = arith.constant 0 : index
    %c0_142 = arith.constant 0 : index
    %158 = vector.load %arg8[%c3_139, %c0_140, %c0_141, %c0_142] : memref<4x2x1x32xf32, #tpu.memory_space<vmem>>, vector<1x1x1x32xf32>
    %159 = vector.shape_cast %158 : vector<1x1x1x32xf32> to vector<1x32xf32>
    %160 = arith.addf %157, %159 : vector<1x32xf32>
    %c3_143 = arith.constant 3 : index
    %c4_144 = arith.constant 4 : index
    %c0_145 = arith.constant 0 : index
    %c0_146 = arith.constant 0 : index
    %161 = vector.load %arg7[%c3_143, %c4_144, %c0_145, %c0_146] : memref<4x5x32x32xf32, #tpu.memory_space<vmem>>, vector<1x1x32x32xf32>
    %162 = vector.shape_cast %161 : vector<1x1x32x32xf32> to vector<32x32xf32>
    %cst_147 = arith.constant dense<0.000000e+00> : vector<1x32xf32>
    %163 = tpu.matmul %152, %162, %cst_147 {dimension_numbers = #tpu.dot_dimension_numbers<[1], [0], [0], [1], [0, 0, 1, 1], [], []>} : vector<1x32xf32>, vector<32x32xf32>, vector<1x32xf32> -> vector<1x32xf32>
    %cst_148 = arith.constant 0.000000e+00 : f32
    %164 = vector.broadcast %cst_148 : f32 to vector<16x32xf32>
    %165 = arith.maximumf %150, %164 : vector<16x32xf32>
    %c3_149 = arith.constant 3 : index
    %c0_150 = arith.constant 0 : index
    %c0_151 = arith.constant 0 : index
    %c0_152 = arith.constant 0 : index
    %166 = vector.load %arg7[%c3_149, %c0_150, %c0_151, %c0_152] : memref<4x5x32x32xf32, #tpu.memory_space<vmem>>, vector<1x1x32x32xf32>
    %167 = vector.shape_cast %166 : vector<1x1x32x32xf32> to vector<32x32xf32>
    %cst_153 = arith.constant dense<0.000000e+00> : vector<16x32xf32>
    %168 = tpu.matmul %165, %167, %cst_153 {dimension_numbers = #tpu.dot_dimension_numbers<[1], [0], [0], [1], [0, 0, 1, 1], [], []>} : vector<16x32xf32>, vector<32x32xf32>, vector<16x32xf32> -> vector<16x32xf32>
    %169 = vector.shape_cast %168 : vector<16x32xf32> to vector<1x16x32xf32>
    %170 = vector.shape_cast %160 : vector<1x32xf32> to vector<1x1x32xf32>
    %171 = vector.broadcast %170 : vector<1x1x32xf32> to vector<1x16x32xf32>
    %172 = arith.addf %169, %171 : vector<1x16x32xf32>
    %173 = vector.shape_cast %172 : vector<1x16x32xf32> to vector<16x32xf32>
    %cst_154 = arith.constant 0.000000e+00 : f32
    %174 = vector.broadcast %cst_154 : f32 to vector<16x32xf32>
    %175 = arith.maximumf %173, %174 : vector<16x32xf32>
    %c3_155 = arith.constant 3 : index
    %c2_156 = arith.constant 2 : index
    %c0_157 = arith.constant 0 : index
    %c0_158 = arith.constant 0 : index
    %176 = vector.load %arg7[%c3_155, %c2_156, %c0_157, %c0_158] : memref<4x5x32x32xf32, #tpu.memory_space<vmem>>, vector<1x1x32x32xf32>
    %177 = vector.shape_cast %176 : vector<1x1x32x32xf32> to vector<32x32xf32>
    %cst_159 = arith.constant dense<0.000000e+00> : vector<16x32xf32>
    %178 = tpu.matmul %175, %177, %cst_159 {dimension_numbers = #tpu.dot_dimension_numbers<[1], [0], [0], [1], [0, 0, 1, 1], [], []>} : vector<16x32xf32>, vector<32x32xf32>, vector<16x32xf32> -> vector<16x32xf32>
    %c3_160 = arith.constant 3 : index
    %c1_161 = arith.constant 1 : index
    %c0_162 = arith.constant 0 : index
    %c0_163 = arith.constant 0 : index
    %179 = vector.load %arg8[%c3_160, %c1_161, %c0_162, %c0_163] : memref<4x2x1x32xf32, #tpu.memory_space<vmem>>, vector<1x1x1x32xf32>
    %180 = vector.shape_cast %179 : vector<1x1x1x32xf32> to vector<1x32xf32>
    %181 = vector.broadcast %180 : vector<1x32xf32> to vector<16x32xf32>
    %182 = arith.addf %178, %181 : vector<16x32xf32>
    %c3_164 = arith.constant 3 : index
    %c3_165 = arith.constant 3 : index
    %c0_166 = arith.constant 0 : index
    %c0_167 = arith.constant 0 : index
    %183 = vector.load %arg7[%c3_164, %c3_165, %c0_166, %c0_167] : memref<4x5x32x32xf32, #tpu.memory_space<vmem>>, vector<1x1x32x32xf32>
    %184 = vector.shape_cast %183 : vector<1x1x32x32xf32> to vector<32x32xf32>
    %cst_168 = arith.constant dense<0.000000e+00> : vector<16x32xf32>
    %185 = tpu.matmul %150, %184, %cst_168 {dimension_numbers = #tpu.dot_dimension_numbers<[1], [0], [0], [1], [0, 0, 1, 1], [], []>} : vector<16x32xf32>, vector<32x32xf32>, vector<16x32xf32> -> vector<16x32xf32>
    %186 = vector.shape_cast %185 : vector<16x32xf32> to vector<1x16x32xf32>
    %187 = vector.shape_cast %163 : vector<1x32xf32> to vector<1x1x32xf32>
    %188 = vector.broadcast %187 : vector<1x1x32xf32> to vector<1x16x32xf32>
    %189 = arith.addf %186, %188 : vector<1x16x32xf32>
    %190 = vector.shape_cast %189 : vector<1x16x32xf32> to vector<16x32xf32>
    %191 = arith.addf %190, %182 : vector<16x32xf32>
    %192 = vector.shape_cast %191 : vector<16x32xf32> to vector<1x16x32xf32>
    %cst_169 = arith.constant dense<0xFF800000> : vector<1x32xf32>
    %193 = vector.multi_reduction <maximumf>, %192, %cst_169 [1] : vector<1x16x32xf32> to vector<1x32xf32>
    %cst_170 = arith.constant 0.000000e+00 : f32
    %194 = vector.broadcast %cst_170 : f32 to vector<1x32xf32>
    %195 = arith.maximumf %193, %194 : vector<1x32xf32>
    %c0_171 = arith.constant 0 : index
    %c0_172 = arith.constant 0 : index
    %196 = vector.load %arg9[%c0_171, %c0_172] : memref<32x16xf32, #tpu.memory_space<vmem>>, vector<32x16xf32>
    %cst_173 = arith.constant dense<0.000000e+00> : vector<1x16xf32>
    %197 = tpu.matmul %195, %196, %cst_173 {dimension_numbers = #tpu.dot_dimension_numbers<[1], [0], [0], [1], [0, 0, 1, 1], [], []>} : vector<1x32xf32>, vector<32x16xf32>, vector<1x16xf32> -> vector<1x16xf32>
    %c0_174 = arith.constant 0 : index
    %c0_175 = arith.constant 0 : index
    %198 = vector.load %arg10[%c0_174, %c0_175] : memref<1x16xf32, #tpu.memory_space<vmem>>, vector<1x16xf32>
    %199 = arith.addf %197, %198 : vector<1x16xf32>
    %200 = vector.shape_cast %199 : vector<1x16xf32> to vector<1x1x16xf32>
    %c0_176 = arith.constant 0 : index
    %c0_177 = arith.constant 0 : index
    %c0_178 = arith.constant 0 : index
    %201 = vector.load %arg11[%c0_176, %c0_177, %c0_178] : memref<1x1x16xf32, #tpu.memory_space<vmem>>, vector<1x1x16xf32>
    tpu.vector_store %arg11[%c0_176, %c0_177, %c0_178], %200 {strides = array<i32>} : memref<1x1x16xf32, #tpu.memory_space<vmem>>, vector<1x1x16xf32>,
    return
  }
  func.func @transform_0(%arg0: i32) -> (i32, i32, i32) {
    %c0_i32 = arith.constant 0 : i32
    %c0_i32_0 = arith.constant 0 : i32
    %c0_i32_1 = arith.constant 0 : i32
    return %arg0, %c0_i32, %c0_i32_0 : i32, i32, i32
  }
  func.func @transform_1(%arg0: i32) -> (i32, i32) {
    %c0_i32 = arith.constant 0 : i32
    %c0_i32_0 = arith.constant 0 : i32
    %c0_i32_1 = arith.constant 0 : i32
    return %c0_i32, %c0_i32_0 : i32, i32
  }
  func.func @transform_2(%arg0: i32) -> (i32, i32) {
    %c0_i32 = arith.constant 0 : i32
    %c0_i32_0 = arith.constant 0 : i32
    %c0_i32_1 = arith.constant 0 : i32
    return %c0_i32, %c0_i32_0 : i32, i32
  }
  func.func @transform_3(%arg0: i32) -> (i32, i32, i32) {
    %c0_i32 = arith.constant 0 : i32
    %c0_i32_0 = arith.constant 0 : i32
    %c0_i32_1 = arith.constant 0 : i32
    %c0_i32_2 = arith.constant 0 : i32
    return %c0_i32, %c0_i32_0, %c0_i32_1 : i32, i32, i32
  }
  func.func @transform_4(%arg0: i32) -> (i32, i32) {
    %c0_i32 = arith.constant 0 : i32
    %c0_i32_0 = arith.constant 0 : i32
    %c0_i32_1 = arith.constant 0 : i32
    return %c0_i32, %c0_i32_0 : i32, i32
  }
  func.func @transform_5(%arg0: i32) -> (i32, i32, i32) {
    %c0_i32 = arith.constant 0 : i32
    %c0_i32_0 = arith.constant 0 : i32
    %c0_i32_1 = arith.constant 0 : i32
    %c0_i32_2 = arith.constant 0 : i32
    return %c0_i32, %c0_i32_0, %c0_i32_1 : i32, i32, i32
  }
  func.func @transform_6(%arg0: i32) -> (i32, i32, i32, i32) {
    %c0_i32 = arith.constant 0 : i32
    %c0_i32_0 = arith.constant 0 : i32
    %c0_i32_1 = arith.constant 0 : i32
    %c0_i32_2 = arith.constant 0 : i32
    %c0_i32_3 = arith.constant 0 : i32
    return %c0_i32, %c0_i32_0, %c0_i32_1, %c0_i32_2 : i32, i32, i32, i32
  }
  func.func @transform_7(%arg0: i32) -> (i32, i32, i32, i32) {
    %c0_i32 = arith.constant 0 : i32
    %c0_i32_0 = arith.constant 0 : i32
    %c0_i32_1 = arith.constant 0 : i32
    %c0_i32_2 = arith.constant 0 : i32
    %c0_i32_3 = arith.constant 0 : i32
    return %c0_i32, %c0_i32_0, %c0_i32_1, %c0_i32_2 : i32, i32, i32, i32
  }
  func.func @transform_8(%arg0: i32) -> (i32, i32) {
    %c0_i32 = arith.constant 0 : i32
    %c0_i32_0 = arith.constant 0 : i32
    %c0_i32_1 = arith.constant 0 : i32
    return %c0_i32, %c0_i32_0 : i32, i32
  }
  func.func @transform_9(%arg0: i32) -> (i32, i32) {
    %c0_i32 = arith.constant 0 : i32
    %c0_i32_0 = arith.constant 0 : i32
    %c0_i32_1 = arith.constant 0 : i32
    return %c0_i32, %c0_i32_0 : i32, i32
  }
  func.func @transform_10(%arg0: i32) -> (i32, i32, i32) {
    %c0_i32 = arith.constant 0 : i32
    %c0_i32_0 = arith.constant 0 : i32
    %c0_i32_1 = arith.constant 0 : i32
    return %arg0, %c0_i32, %c0_i32_0 : i32, i32, i32
  }
}

</mosaic_0001>

<bundles_post_ra>
// kernel: tpu_custom_call.1
= control target key start
LH: loop header
LB: loop body
LE: loop exit
PB: predicated region body
PF: predicated region fallthrough
CT: control target
= control target key end

     0   :  { %15 = vsyncpa [#allocation3], 0  ;;  %s4051_s0 = inlined_call_operand.vmem [shape: f32[2,16,12], index: 0, kind: input, shape index: {}]   ;;  %s4052_s1 = inlined_call_operand.vmem [shape: f32[12,64], index: 1, kind: input, shape index: {}]   ;;  %s4053_s2 = inlined_call_operand.vmem [shape: f32[1,64], index: 2, kind: input, shape index: {}]   ;;  %s4054_s3 = inlined_call_operand.vmem [shape: f32[2,64,32], index: 3, kind: input, shape index: {}]   ;;  %s4055_s4 = inlined_call_operand.vmem [shape: f32[32,32], index: 4, kind: input, shape index: {}]   ;;  %s4056_s5 = inlined_call_operand.vmem [shape: f32[2,1,32], index: 5, kind: input, shape index: {}]   ;;  %s4057_s6 = inlined_call_operand.hbm [shape: f32[4,5,32,32], index: 6, kind: input, shape index: {}]   ;;  %s4058_s7 = inlined_call_operand.vmem [shape: f32[4,2,1,32], index: 7, kind: input, shape index: {}]   ;;  %s4059_s8 = inlined_call_operand.vmem [shape: f32[32,16], index: 8, kind: input, shape index: {}]   ;;  %s4060_s9 = inlined_call_operand.vmem [shape: f32[1,16], index: 9, kind: input, shape index: {}]   ;;  %s4061_s10 = inlined_call_operand.hbm [shape: f32[2,1,16], index: 10, kind: output, shape index: {}]  }
   0x1   :  { %16 = vsyncpa [#allocation4], 0 }
   0x2   :  { %18 = vsyncpa [#allocation4 + $0x1], 0  ;;  %s3680_s13 = smov 0   ;;  %s3682_s14 = smov 0  }
   0x3   :  { %s3684_s15 = smov 0   ;;  %s3686_s16 = smov 0  }
   0x4 LB: > { %s3701_s17 = sadd.s32 4294967295, %s3615_s16   ;;  %s2730_s18 = sadd.s32 4294967294, %s3615_s16   ;;  %s3615_s16 = sphi %s3686_s16, %s4077_s16   ;;  %s3611_s15 = sphi %s3684_s15, %s4076_s15   ;;  %s3607_s14 = sphi %s3682_s14, %s4075_s14   ;;  %s3603_s13 = sphi %s3680_s13, %s4074_s13  }
   0x5   : > { %s3705_s19 = sadd.s32 1, %s3615_s16   ;;  %s246_s20 = sadd.s32 1, %s3611_s15 }
   0x6   : > { %s243_s21 = ssub.s32 %s3615_s16, %s3705_s19  ;;  %p256_p0 = scmp.ne.s32.totalorder %s3611_s15, %s3607_s14 }
   0x7   : > { %p244_p1 = scmp.eq.s32.totalorder %s243_s21, 0  ;;  %p257_p2 = scmp.eq.s32.totalorder %s3701_s17, 1 }
   0x8   : > { %p262_p3 = scmp.ne.s32.totalorder %s3607_s14, %s3603_s13  ;;  %p263_p4 = scmp.eq.s32.totalorder %s2730_s18, 1 }
   0x9   : > { %s3716_s22 = scalar_select %p244_p1, %s3611_s15, %s246_s20  }
   0xa   : > { %p3718_p5 = por %p257_p2, %p256_p0  ;;  %p3722_p6 = por %p263_p4, %p262_p3 }
   0xb   : > { %p2731_p7 = scmp.ge.s32.totalorder %s3615_s16, 1  ;;  %p270_p8 = scmp.lt.s32.totalorder %s3615_s16, 3 }
   0xc   : > { %s4065_s23 = scalar_select %p3718_p5, 1, 0 }
   0xd   : > { %s4066_s24 = scalar_select %p3722_p6, 1, 0 }
   0xe   : > { %p4062_p9 = scmp.eq.s32.totalorder %s3701_s17, 0  ;;  %p3729_p10 = pnand %p2731_p7, %p270_p8 }
   0xf   : > { %s3617_s26 = smov [#allocation2]   ;;  %s3521_s11 = scalar_lea.hbm %s4057_s6, 10240 }
  0x10   : > { %s4067_s25 = scalar_select %p3729_p10, 1, 0 }
  0x11   : > { %s297_s27 = sshll.u32 %s3617_s26, 4  ;;  %p3471_p11 = pneg %p3729_p10  ;;  %s298_s27 = int_to_ptr.vmem [resolvable:$true] %s297_s27 }
  0x12   : > { %p3522_p13 = scmp.ne.s32.totalorder %s4057_s6, %s3521_s11  ;;  %p3528_p3 = scmp.lt.u32.totalorder %s3521_s11, %s4057_s6 }
  0x13   : > { %p3737_p12 = pnand %p4062_p9, %p3471_p11 }
  0x15   : > { %p3523_p0 = pneg %p3737_p12 }
  0x17   : > { %p3524_p1 = pnand %p3523_p0, %p3522_p13 }
  0x19   : > { %p3525_p2 = pneg %p3524_p1 }
  0x1b   : > { %p3530_p4 = pnand %p3528_p3, %p3525_p2 }
  0x1d   : > { %3533 = shalt.err (!%p3530_p4)
}
  0x1e   : > { %s3534_s26 = scalar_lea.vmem %s298_s27, 10240  ;;  %p3542_p9 = scmp.lt.s32.totalorder %s298_s27, %s298_s27 }
  0x1f   : > { %p3535_p7 = scmp.ne.s32.totalorder %s298_s27, %s3534_s26  ;;  %p3543_p6 = scmp.lt.s32.totalorder %s3534_s26, %s3534_s26 }
  0x21   : > { %p3537_p8 = pnand %p3535_p7, %p3523_p0  ;;  %p3544_p5 = por %p3543_p6, %p3542_p9 }
  0x23   : > { %p3538_p11 = pneg %p3537_p8 }
  0x25   : > { %p3545_p10 = pnand %p3544_p5, %p3538_p11 }
  0x27   : > { %3548 = shalt.err (!%p3545_p10)
}
  0x28   : > { %s3618_s29 = smov 128   ;;  %s3619_s30 = smov 8  }
  0x29   : > { %3474 = dma.hbm_to_vmem [thread:$0]  (!%p3737_p12), %s4057_s6, 10240, %s298_s27, [#allocation3], %s3618_s29, %s3618_s29, %s3619_s30  }
  0x2a   : > { %p4069_p13 = scmp.ne.s32.totalorder %s4067_s25, 0 }
  0x2b   : > { %p4070_p1 = scmp.eq.s32.totalorder (!%p4069_p13), %s3701_s17, 0 }
  0x2c   : > { %330 = sbr.rel (%p4069_p13) target bundleno = 2824 (0xb08), region = 60 }
  0x33   : > { %3594 = dma.done.wait (%p4070_p1), [#allocation3], 10240   ;;  %p4071_p0 = pmov %p4070_p1 }
  0x34   : > { %p367_p5 = scmp.lt.s32.totalorder %s3701_s17, 1  ;;  %vm390_vm0 = vcmask 1043456   ;;  %vm383_vm1 = vcmask 97280   ;;  %vm3620_vm2 = vmmov 1   ;;  %v374_v0 = vld [vmem:[%s4052_s1] sm:$0xff]  ;;  %v472_v5 = vld [vmem:[%s4054_s3 + $0x8] sm:$0xff] }
  0x35   : > { %3596 = vsyncadd (%p4071_p0), [#allocation3], 4294957056  ;;  %v375_v1 = vld [vmem:[%s4052_s1 + $0x8] sm:$0xf]  ;;  %v471_v4 = vld [vmem:[%s4054_s3] sm:$0xff]  ;;  %vm486_vm4 = vcmask 523264  }
  0x36   : > { %s368_s11 = scalar_select %p367_p5, %s3701_s17, 1  ;;  %vm3242_vm3 = vmpackc.low %vm390_vm0, %vm3620_vm2  ;;  %v3241_v3 = vpack.c.bf16 %v375_v1, %v374_v0  ;;  %v3247_v6 = vpack.c.bf16 %v472_v5, %v471_v4  ;;  %v473_v7 = vld [vmem:[%s4054_s3 + $0x10] sm:$0xff]  ;;  %v474_v8 = vld [vmem:[%s4054_s3 + $0x18] sm:$0xff]  ;;  %vm582_vm5 = vcmask 261120   ;;  %v3621_v58 = vmov 0.0|0.0  }
  0x37   : > { %v3251_v9 = vpack.c.bf16 %v474_v8, %v473_v7  ;;  %v475_v10 = vld [vmem:[%s4054_s3 + $0x20] sm:$0xff]  ;;  %v476_v11 = vld [vmem:[%s4054_s3 + $0x28] sm:$0xff]  ;;  %v477_v14 = vld [vmem:[%s4054_s3 + $0x30] sm:$0xff]  ;;  %vm3622_vm6 = vmmov 0   ;;  %v3623_v62 = vmov 0.0   ;;  %s365_s21 = sand.u32 1, %s3607_s14  }
  0x38   : > { %s2806_s20 = sshll.u32 %s368_s11, 4  ;;  %3243 = vmatprep.subr.msk.bf16.mxu0 %vm3242_vm3, %v3241_v3  ;;  %3248 = vmatprep.subr.bf16.mxu1 %v3247_v6  ;;  %v3255_v13 = vpack.c.bf16 %v476_v11, %v475_v10  ;;  %v478_v15 = vld [vmem:[%s4054_s3 + $0x38] sm:$0xff]  ;;  %v570_v17 = vld [vmem:[%s4055_s4] sm:$0xff]  ;;  %v571_v18 = vld [vmem:[%s4055_s4 + $0x8] sm:$0xff]  ;;  %s2803_s27 = sshll.u32 %s3701_s17, 4  ;;  %vm2648_vm7 = vcmask 122880  }
  0x39   : > { %s371_s26 = scalar_lea.vmem %s4051_s0, %s2806_s20  ;;  %3246 = vmatpush3.bf16.msk.msra.mxu0 %vm3242_vm3, %v3241_v3  ;;  %3250 = vmatpush3.bf16.msra.mxu1 %v3247_v6  ;;  %v3259_v16 = vpack.c.bf16 %v478_v15, %v477_v14  ;;  %v3263_v19 = vpack.c.bf16 %v571_v18, %v570_v17  ;;  %v2738_v20 = vld [vmem:[%s4053_s2] ss:$0 sm:$0xff]  ;;  %v572_v27 = vld [vmem:[%s4055_s4 + $0x10] sm:$0xff]  ;;  %v573_v28 = vld [vmem:[%s4055_s4 + $0x18] sm:$0xff]  ;;  %s366_s29 = scalar_lea.vmem [#allocation5], %s365_s21 }
  0x3a   : > { %v372_v2 = vld [vmem:[%s371_s26] sm:$0xff]  ;;  %v373_v12 = vld [vmem:[%s371_s26 + $0x8] sm:$0xff]  ;;  %3252 = vmatprep.subr.bf16.mxu1 %v3251_v9  ;;  %v3267_v29 = vpack.c.bf16 %v573_v28, %v572_v27  ;;  %v2751_v38 = vld [vmem:[%s4054_s3 + $0x50] sm:$0xff]  ;;  %s2663_s30 = sshll.u32 %s366_s29, 4  ;;  %s4009_s11 = scalar_lea.hbm %s4061_s10, %s2803_s27  ;;  %s4011_s30 = int_to_ptr.vmem [resolvable:$true] %s2663_s30 }
  0x3b   : > { %2958 = vmatprep.mubr.msk.f32.mxu0 %vm383_vm1, %v372_v2  ;;  %3264 = vmatprep.subr.bf16.mxu0 %v3263_v19  ;;  %v2749_v30 = vld [vmem:[%s4054_s3 + $0x40] sm:$0xff]  ;;  %v2750_v31 = vld [vmem:[%s4054_s3 + $0x48] sm:$0xff]  ;;  %v2752_v39 = vld [vmem:[%s4054_s3 + $0x58] sm:$0xff]  ;;  %s2651_s20 = scalar_lea.sflag [#allocation4], %s365_s21  ;;  %s3549_s28 = scalar_lea.vmem %s4011_s30, 16 }
  0x3c   : > { %2959 = vmatmul.mubr.msk.f32.vlgmr.msra.gmra.mrb[0].mxu0 %vm383_vm1, %v373_v12  ;;  %v3271_v32 = vpack.c.bf16 %v2750_v31, %v2749_v30  ;;  %v2742_v33 = vld [vmem:[%s4056_s5] ss:$0 sm:$0xff]  ;;  %v3275_v42 = vpack.c.bf16 %v2752_v39, %v2751_v38  ;;  %v2754_v44 = vld [vmem:[%s4054_s3 + $0x68] sm:$0xff]  ;;  %v2755_v46 = vld [vmem:[%s4054_s3 + $0x70] sm:$0xff]  ;;  %p3550_p6 = scmp.ne.s32.totalorder %s4011_s30, %s3549_s28  ;;  %p4072_p9 = scmp.ne.s32.totalorder %s4065_s23, 0 }
  0x3d   : > { %3254 = vmatpush3.bf16.msra.mxu1 %v3251_v9  ;;  %3266 = vmatpush3.bf16.msra.mxu0 %v3263_v19  ;;  %v2753_v43 = vld [vmem:[%s4054_s3 + $0x60] sm:$0xff]  ;;  %v2756_v47 = vld [vmem:[%s4054_s3 + $0x78] sm:$0xff]  ;;  %v924_v50 = vld [vmem:[#allocation2 + $0x8] sm:$0xff]  ;;  %s3624_s17 = smov [#allocation5]  }
  0x3e   : > { %3256 = vmatprep.subr.bf16.mxu1 %v3255_v13  ;;  %3268 = vmatprep.subr.bf16.mxu0 %v3267_v29  ;;  %v3279_v45 = vpack.c.bf16 %v2754_v44, %v2753_v43  ;;  %v3283_v48 = vpack.c.bf16 %v2756_v47, %v2755_v46  ;;  %v923_v49 = vld [vmem:[#allocation2] sm:$0xff]  ;;  %v925_v52 = vld [vmem:[#allocation2 + $0x10] sm:$0xff]  ;;  %v926_v53 = vld [vmem:[#allocation2 + $0x18] sm:$0xff]  ;;  %p3551_p10 = pnand %p3550_p6, %p4072_p9  ;;  %s3553_s26 = sshll.u32 %s3624_s17, 4  ;;  %s3554_s26 = int_to_ptr.vmem [resolvable:$false] %s3553_s26 }
  0x3f   : > { %v3299_v51 = vpack.c.bf16 %v924_v50, %v923_v49  ;;  %v3303_v54 = vpack.c.bf16 %v926_v53, %v925_v52  ;;  %v765_v55 = vld [vmem:[#allocation2 + $0x20] sm:$0xff]  ;;  %v766_v56 = vld [vmem:[#allocation2 + $0x28] sm:$0xff]  ;;  %v767_v59 = vld [vmem:[#allocation2 + $0x30] sm:$0xff]  ;;  %s3555_s25 = scalar_lea.vmem %s3554_s26, 32  ;;  %p3556_p2 = scmp.lt.s32.totalorder %s4011_s30, %s3554_s26 }
  0x40   : > { %v3288_v57 = vpack.c.bf16 %v766_v56, %v765_v55  ;;  %v768_v60 = vld [vmem:[#allocation2 + $0x38] sm:$0xff]  ;;  %v2746_v63 = vld [vmem:[%s4056_s5 + $0x1] ss:$0 sm:$0xff]  ;;  %v845_v15 = vld [vmem:[#allocation2 + $0x88] sm:$0xff]  ;;  %p3552_p12 = pneg %p3551_p10  ;;  %p3557_p3 = scmp.lt.s32.totalorder %s3555_s25, %s3549_s28 }
  0x41   : > { %3258 = vmatpush3.bf16.msra.mxu1 %v3255_v13  ;;  %3270 = vmatpush3.bf16.msra.mxu0 %v3267_v29  ;;  %v3291_v61 = vpack.c.bf16 %v768_v60, %v767_v59  ;;  %v844_v14 = vld [vmem:[#allocation2 + $0x80] sm:$0xff]  ;;  %v846_v19 = vld [vmem:[#allocation2 + $0x90] sm:$0xff]  ;;  %v1112_v29 = vld [vmem:[#allocation2 + $0x68] sm:$0xff] }
  0x42   : > { %3260 = vmatprep.subr.bf16.mxu1 %v3259_v16  ;;  %3272 = vmatprep.subr.bf16.mxu0 %v3271_v32  ;;  %v3294_v17 = vpack.c.bf16 %v845_v15, %v844_v14  ;;  %v1111_v28 = vld [vmem:[#allocation2 + $0x60] sm:$0xff]  ;;  %v1113_v43 = vld [vmem:[#allocation2 + $0x70] sm:$0xff]  ;;  %v1114_v44 = vld [vmem:[#allocation2 + $0x78] sm:$0xff]  ;;  %p3558_p4 = por %p3557_p3, %p3556_p2 }
  0x43   : > { %v3315_v30 = vpack.c.bf16 %v1112_v29, %v1111_v28  ;;  %v1375_v50 = vld [vmem:[#allocation2 + $0xa0] sm:$0xff]  ;;  %v1377_v53 = vld [vmem:[#allocation2 + $0xb0] sm:$0xff] }
  0x44   : > { %v1215_v56 = vld [vmem:[#allocation2 + $0xc0] sm:$0xff]  ;;  %v1217_v60 = vld [vmem:[#allocation2 + $0xd0] sm:$0xff]  ;;  %p3559_p7 = pnand %p3558_p4, %p3552_p12 }
  0x45   : > { %3262 = vmatpush3.bf16.msra.mxu1 %v3259_v16  ;;  %v1471_v29 = vld [vmem:[#allocation2 + $0xf0] sm:$0xff] }
  0x46   : > { %3287 = vmatprep.subr.bf16.mxu1 %v3621_v58 }
 0x10f   : > { %v2960_v21 = vpop.f32.mrb[0].mxu0 }
 0x110   : > { %v466_v22 = vadd.f32 %v2960_v21, %v2738_v20  ;;  %v460_v23 = vpop.f32.mrb[1].mxu0 }
 0x111   : > { %v461_v24 = vadd.f32 %v2738_v20, %v460_v23  ;;  %v847_v20 = vld [vmem:[#allocation2 + $0x98] sm:$0xff]  ;;  %v1018_v23 = vld [vmem:[#allocation2 + $0x48] sm:$0xff] }
 0x112   : > { %v470_v26 = vmax.f32 %v466_v22, 0.0  ;;  %v3297_v21 = vpack.c.bf16 %v847_v20, %v846_v19  ;;  %v1296_v19 = vld [vmem:[#allocation2 + $0x128] sm:$0xff] }
 0x113   : > { %v469_v25 = vmax.f32 %v461_v24, 0.0 }
 0x115   : > { %2977 = vmatprep.mubr.msk.f32.mxu1 %vm486_vm4, %v469_v25  ;;  %v1019_v25 = vld [vmem:[#allocation2 + $0x50] sm:$0xff] }
 0x116   : > { %2978 = vmatmul.mubr.msk.f32.vlgmr.msra.gmra.mrb[0].mxu1 %vm486_vm4, %v470_v26  ;;  %v1020_v26 = vld [vmem:[#allocation2 + $0x58] sm:$0xff] }
 0x117   : > { %3289 = vmatpush3.bf16.msra.mxu1 %v3288_v57  ;;  %3018 = vmatprep.mubr.msk.f32.mxu1 %vm3622_vm6, %v3623_v62  ;;  %v3311_v27 = vpack.c.bf16 %v1020_v26, %v1019_v25  ;;  %v1216_v57 = vld [vmem:[#allocation2 + $0xc8] sm:$0xff]  ;;  %v1469_v26 = vld [vmem:[#allocation2 + $0xe0] sm:$0xff] }
 0x118   : > { %3290 = vmatprep.subr.bf16.mxu1 %v3621_v58  ;;  %v3324_v59 = vpack.c.bf16 %v1216_v57, %v1215_v56  ;;  %v1830_v56 = vld [vmem:[#allocation2 + $0x158] sm:$0xff] }
 0x11b   : > { %3292 = vmatpush3.bf16.msra.mxu1 %v3291_v61  ;;  %v1218_v61 = vld [vmem:[#allocation2 + $0xd8] sm:$0xff] }
 0x11c   : > { %3293 = vmatprep.subr.bf16.mxu1 %v3621_v58 }
 0x1e9   : > { %v2979_v34 = vpop.f32.mrb[0].mxu1 }
 0x1ea   : > { %v565_v35 = vadd.f32 %v2979_v34, %v2742_v33  ;;  %v559_v36 = vpop.f32.mrb[1].mxu1 }
 0x1eb   : > { %v560_v37 = vadd.f32 %v2742_v33, %v559_v36  ;;  %v1008_v33 = vlaneseq }
 0x1ec   : > { %v569_v41 = vmax.f32 %v565_v35, 0.0  ;;  %v769_v35 = vld [vmem:[%s4058_s7] sm:$0x1] }
 0x1ed   : > { %v568_v40 = vmax.f32 %v560_v37, 0.0  ;;  %v1009_v34 = vshrl.u32 %v1008_v33, 7  ;;  %v1564_v33 = vld [vmem:[#allocation2 + $0x108] sm:$0xff] }
 0x1ef   : > { %2988 = vmatprep.mubr.msk.f32.mxu0 %vm582_vm5, %v568_v40  ;;  %v3879_v36 = vsub.s32 0, %v1009_v34 }
 0x1f0   : > { %2989 = vmatmul.mubr.msk.f32.vlgmr.msra.gmra.mrb[2].mxu0 %vm582_vm5, %v569_v41 }
 0x1f1   : > { %3274 = vmatpush3.bf16.msra.mxu0 %v3271_v32  ;;  %3007 = vmatprep.mubr.msk.f32.mxu0 %vm486_vm4, %v461_v24 }
 0x1f2   : > { %3276 = vmatprep.subr.bf16.mxu0 %v3275_v42 }
 0x1f5   : > { %3278 = vmatpush3.bf16.msra.mxu0 %v3275_v42 }
 0x1f6   : > { %3280 = vmatprep.subr.bf16.mxu0 %v3279_v45 }
 0x1f9   : > { %3282 = vmatpush3.bf16.msra.mxu0 %v3279_v45 }
 0x1fa   : > { %3284 = vmatprep.subr.bf16.mxu0 %v3283_v48 }
 0x1fd   : > { %3286 = vmatpush3.bf16.msra.mxu0 %v3283_v48  ;;  %v3319_v48 = vpack.c.bf16 %v1114_v44, %v1113_v43 }
 0x1fe   : > { %3300 = vmatprep.subr.bf16.mxu0 %v3299_v51 }
 0x200   : > { %3008 = vmatmul.mubr.msk.f32.vlgmr.msra.gmra.mrb[2].mxu0 %vm486_vm4, %v466_v22  ;;  %v1017_v22 = vld [vmem:[#allocation2 + $0x40] sm:$0xff] }
 0x201   : > { %3302 = vmatpush3.bf16.msra.mxu0 %v3299_v51  ;;  %v3307_v24 = vpack.c.bf16 %v1018_v23, %v1017_v22  ;;  %v1376_v51 = vld [vmem:[#allocation2 + $0xa8] sm:$0xff]  ;;  %v1297_v23 = vld [vmem:[#allocation2 + $0x130] sm:$0xff] }
 0x202   : > { %3304 = vmatprep.subr.bf16.mxu0 %v3303_v54  ;;  %v3335_v52 = vpack.c.bf16 %v1376_v51, %v1375_v50 }
 0x205   : > { %3306 = vmatpush3.bf16.msra.mxu0 %v3303_v54  ;;  %v1378_v54 = vld [vmem:[#allocation2 + $0xb8] sm:$0xff] }
 0x206   : > { %3323 = vmatprep.subr.bf16.mxu0 %v3621_v58  ;;  %v3339_v55 = vpack.c.bf16 %v1378_v54, %v1377_v53  ;;  %v1828_v53 = vld [vmem:[#allocation2 + $0x148] sm:$0xff] }
 0x2d3   : > { %v3009_v0 = vpop.f32.mrb[2].mxu0 }
 0x2d4   : > { %v3857_v1 = vadd.f32 %v3009_v0, %v2746_v63  ;;  %v745_v2 = vpop.f32.mrb[3].mxu0  ;;  %v2764_v0 = vld [vmem:[%s4058_s7 + $0x1] ss:$0 sm:$0xff] }
 0x2d5   : > { %v3859_v3 = vadd.f32 %v2746_v63, %v745_v2  ;;  %v3327_v63 = vpack.c.bf16 %v1218_v61, %v1217_v60  ;;  %v1668_v60 = vld [vmem:[#allocation2 + $0x168] sm:$0xff] }
 0x2d6   : > { %v755_v4 = vsel %vm582_vm5, %v3857_v1, -inf  ;;  %v922_v7 = vmax.f32 %v3857_v1, 0.0 }
 0x2d7   : > { %v754_v5 = vsel %vm582_vm5, %v3859_v3, -inf  ;;  %v921_v6 = vmax.f32 %v3859_v3, 0.0 }
 0x2d8   : > { %v756_v8 = vmax.f32 %v754_v5, %v755_v4 }
 0x2d9   : > { %3040 = vmatprep.mubr.msk.f32.mxu0 %vm582_vm5, %v921_v6 }
 0x2da   : > { %v757_v9 = vrot.slane %v756_v8, 4  ;;  %3041 = vmatmul.mubr.msk.f32.vlgmr.msra.gmra.mrb[4].mxu0 %vm582_vm5, %v922_v7 }
 0x2db   : > { %3073 = vmatprep.mubr.msk.f32.mxu0 %vm3622_vm6, %v3623_v62  ;;  %3325 = vmatpush3.bf16.msra.mxu0 %v3324_v59  ;;  %v1667_v59 = vld [vmem:[#allocation2 + $0x160] sm:$0xff] }
 0x2dc   : > { %v758_v10 = vmax.f32 %v756_v8, %v757_v9  ;;  %3326 = vmatprep.subr.bf16.mxu0 %v3621_v58  ;;  %v3360_v61 = vpack.c.bf16 %v1668_v60, %v1667_v59  ;;  %v2282_v59 = vld [vmem:[#allocation2 + $0x1f8] sm:$0xff] }
 0x2de   : > { %v759_v11 = vrot.slane %v758_v10, 2 }
 0x2df   : > { %3328 = vmatpush3.bf16.msra.mxu0 %v3327_v63  ;;  %v1669_v63 = vld [vmem:[#allocation2 + $0x170] sm:$0xff] }
 0x2e0   : > { %v760_v12 = vmax.f32 %v758_v10, %v759_v11  ;;  %3329 = vmatprep.subr.bf16.mxu0 %v3621_v58 }
 0x2e2   : > { %v761_v13 = vrot.slane %v760_v12, 1 }
 0x2e4   : > { %v762_v16 = vmax.f32 %v760_v12, %v761_v13 }
 0x2e6   : > { %v763_v18 = vmax.f32 %v762_v16, 0.0 }
 0x2e8   : > { %3019 = vmatmul.mubr.msk.f32.vlgmr.msra.gmra.mrb[2].mxu1 %vm582_vm5, %v763_v18  ;;  %v1295_v18 = vld [vmem:[#allocation2 + $0x120] sm:$0xff] }
 0x2e9   : > { %3295 = vmatpush3.bf16.msra.mxu1 %v3294_v17  ;;  %3029 = vmatprep.mubr.msk.f32.mxu1 %vm3622_vm6, %v3623_v62 }
 0x2ea   : > { %3296 = vmatprep.subr.bf16.mxu1 %v3621_v58 }
 0x2ed   : > { %3298 = vmatpush3.bf16.msra.mxu1 %v3297_v21  ;;  %v3330_v21 = vpack.c.bf16 %v1296_v19, %v1295_v18 }
 0x2ee   : > { %3308 = vmatprep.subr.bf16.mxu1 %v3307_v24 }
 0x2f0   : > { %3030 = vmatmul.mubr.msk.f32.vlgmr.msra.gmra.mrb[4].mxu1 %vm582_vm5, %v762_v16 }
 0x2f1   : > { %3310 = vmatpush3.bf16.msra.mxu1 %v3307_v24  ;;  %v1298_v24 = vld [vmem:[#allocation2 + $0x138] sm:$0xff] }
 0x2f2   : > { %3312 = vmatprep.subr.bf16.mxu1 %v3311_v27  ;;  %v3333_v25 = vpack.c.bf16 %v1298_v24, %v1297_v23 }
 0x2f5   : > { %3314 = vmatpush3.bf16.msra.mxu1 %v3311_v27  ;;  %v1470_v27 = vld [vmem:[#allocation2 + $0xe8] sm:$0xff] }
 0x2f6   : > { %3316 = vmatprep.subr.bf16.mxu1 %v3315_v30  ;;  %v3343_v28 = vpack.c.bf16 %v1470_v27, %v1469_v26  ;;  %v1750_v26 = vld [vmem:[#allocation2 + $0x1d8] sm:$0xff] }
 0x3ad   : > { %v3042_v31 = vpop.f32.mrb[4].mxu0 }
 0x3ae   : > { %v999_v32 = vpop.f32.mrb[5].mxu0 }
 0x3bb   : > { %v839_v37 = vpop.f32.mrb[2].mxu1 }
 0x3bc   : > { %v840_v38 = vadd.f32 %v839_v37, %v769_v35  ;;  %v3020_v39 = vpop.f32.mrb[3].mxu1 }
 0x3be   : > { %v1011_v40 = vrot.slane %v840_v38, %v3879_v36  ;;  %v2769_v38 = vld [vmem:[%s4058_s7 + $0x2] sm:$0x1] }
 0x3c0   : > { %v1012_v41 = vadd.f32 %v1011_v40, %v999_v32  ;;  %v1013_v42 = vadd.f32 %v3042_v31, %v1011_v40  ;;  %v1563_v32 = vld [vmem:[#allocation2 + $0x100] sm:$0xff] }
 0x3c1   : > { %v3351_v34 = vpack.c.bf16 %v1564_v33, %v1563_v32  ;;  %v1924_v32 = vld [vmem:[#allocation2 + $0x198] sm:$0xff] }
 0x3c2   : > { %v1014_v45 = vmax.f32 %v1012_v41, 0.0  ;;  %v1015_v46 = vmax.f32 %v1013_v42, 0.0 }
 0x3c3   : > { %v917_v47 = vpop.f32.mrb[4].mxu1 }
 0x3c4   : > { %v3031_v49 = vpop.f32.mrb[5].mxu1  ;;  %3051 = vmatprep.mubr.msk.f32.mxu1 %vm582_vm5, %v1014_v45  ;;  %v1199_v2 = vrot.slane %v917_v47, %v3879_v36  ;;  %v1565_v45 = vld [vmem:[#allocation2 + $0x110] sm:$0xff] }
 0x3c5   : > { %3052 = vmatmul.mubr.msk.f32.vlgmr.msra.gmra.mrb[6].mxu1 %vm582_vm5, %v1015_v46  ;;  %v1566_v46 = vld [vmem:[#allocation2 + $0x118] sm:$0xff] }
 0x3c6   : > { %3318 = vmatpush3.bf16.msra.mxu1 %v3315_v30  ;;  %3062 = vmatprep.mubr.msk.f32.mxu1 %vm582_vm5, %v3859_v3  ;;  %v1472_v30 = vld [vmem:[#allocation2 + $0xf8] sm:$0xff]  ;;  %v3355_v50 = vpack.c.bf16 %v1566_v46, %v1565_v45 }
 0x3c7   : > { %3320 = vmatprep.subr.bf16.mxu1 %v3319_v48  ;;  %v3347_v31 = vpack.c.bf16 %v1472_v30, %v1471_v29  ;;  %v1922_v29 = vld [vmem:[#allocation2 + $0x188] sm:$0xff] }
 0x3ca   : > { %3322 = vmatpush3.bf16.msra.mxu1 %v3319_v48 }
 0x3cb   : > { %3336 = vmatprep.subr.bf16.mxu1 %v3335_v52 }
 0x3cd   : > { %3063 = vmatmul.mubr.msk.f32.vlgmr.msra.gmra.mrb[6].mxu1 %vm582_vm5, %v3857_v1 }
 0x3ce   : > { %3338 = vmatpush3.bf16.msra.mxu1 %v3335_v52  ;;  %v1827_v52 = vld [vmem:[#allocation2 + $0x140] sm:$0xff] }
 0x3cf   : > { %3340 = vmatprep.subr.bf16.mxu1 %v3339_v55  ;;  %v3371_v54 = vpack.c.bf16 %v1828_v53, %v1827_v52 }
 0x3d2   : > { %3342 = vmatpush3.bf16.msra.mxu1 %v3339_v55  ;;  %v1829_v55 = vld [vmem:[#allocation2 + $0x150] sm:$0xff] }
 0x3d3   : > { %3359 = vmatprep.subr.bf16.mxu1 %v3621_v58  ;;  %v3375_v57 = vpack.c.bf16 %v1830_v56, %v1829_v55  ;;  %v2280_v55 = vld [vmem:[#allocation2 + $0x1e8] sm:$0xff] }
 0x4a0   : > { %v3064_v1 = vpop.f32.mrb[6].mxu1 }
 0x4a1   : > { %v3439_v3 = vadd.f32 %v3064_v1, %v2764_v0  ;;  %v1187_v4 = vpop.f32.mrb[7].mxu1 }
 0x4a2   : > { %v3441_v5 = vadd.f32 %v2764_v0, %v1187_v4  ;;  %v1670_v0 = vld [vmem:[#allocation2 + $0x178] sm:$0xff] }
 0x4a3   : > { %v3895_v6 = vadd.f32 %v3439_v3, %v1199_v2  ;;  %v3363_v1 = vpack.c.bf16 %v1670_v0, %v1669_v63  ;;  %v2120_v63 = vld [vmem:[#allocation2 + $0x208] sm:$0xff] }
 0x4a4   : > { %v3442_v7 = vadd.f32 %v3441_v5, %v1199_v2  ;;  %v2775_v2 = vld [vmem:[%s4058_s7 + $0x3] ss:$0 sm:$0xff] }
 0x4a5   : > { %v1205_v8 = vsel %vm582_vm5, %v3895_v6, -inf  ;;  %v1373_v11 = vmax.f32 %v3895_v6, 0.0 }
 0x4a6   : > { %v1204_v9 = vsel %vm582_vm5, %v3442_v7, -inf  ;;  %v1372_v10 = vmax.f32 %v3442_v7, 0.0 }
 0x4a7   : > { %v1206_v12 = vmax.f32 %v1204_v9, %v1205_v8 }
 0x4a8   : > { %3095 = vmatprep.mubr.msk.f32.mxu1 %vm582_vm5, %v1372_v10 }
 0x4a9   : > { %v1207_v13 = vrot.slane %v1206_v12, 4  ;;  %3096 = vmatmul.mubr.msk.f32.vlgmr.msra.gmra.mrb[8].mxu1 %vm582_vm5, %v1373_v11 }
 0x4aa   : > { %3128 = vmatprep.mubr.msk.f32.mxu1 %vm3622_vm6, %v3623_v62  ;;  %3361 = vmatpush3.bf16.msra.mxu1 %v3360_v61  ;;  %v2119_v61 = vld [vmem:[#allocation2 + $0x200] sm:$0xff] }
 0x4ab   : > { %v1208_v14 = vmax.f32 %v1206_v12, %v1207_v13  ;;  %3362 = vmatprep.subr.bf16.mxu1 %v3621_v58  ;;  %v3396_v0 = vpack.c.bf16 %v2120_v63, %v2119_v61  ;;  %v2797_v63 = vld [vmem:[%s4058_s7 + $0x7] ss:$0 sm:$0xff] }
 0x4ad   : > { %v1209_v15 = vrot.slane %v1208_v14, 2 }
 0x4ae   : > { %3364 = vmatpush3.bf16.msra.mxu1 %v3363_v1  ;;  %v2121_v1 = vld [vmem:[#allocation2 + $0x210] sm:$0xff] }
 0x4af   : > { %v1210_v16 = vmax.f32 %v1208_v14, %v1209_v15  ;;  %3365 = vmatprep.subr.bf16.mxu1 %v3621_v58 }
 0x4b1   : > { %v1211_v17 = vrot.slane %v1210_v16, 1 }
 0x4b3   : > { %v1212_v20 = vmax.f32 %v1210_v16, %v1211_v17 }
 0x4b5   : > { %v1213_v22 = vmax.f32 %v1212_v20, 0.0 }
 0x4b7   : > { %3074 = vmatmul.mubr.msk.f32.vlgmr.msra.gmra.mrb[6].mxu0 %vm582_vm5, %v1213_v22 }
 0x4b8   : > { %3331 = vmatpush3.bf16.msra.mxu0 %v3330_v21  ;;  %3084 = vmatprep.mubr.msk.f32.mxu0 %vm3622_vm6, %v3623_v62  ;;  %v1748_v21 = vld [vmem:[#allocation2 + $0x1c8] sm:$0xff] }
 0x4b9   : > { %3332 = vmatprep.subr.bf16.mxu0 %v3621_v58 }
 0x4bc   : > { %3334 = vmatpush3.bf16.msra.mxu0 %v3333_v25  ;;  %v1749_v25 = vld [vmem:[#allocation2 + $0x1d0] sm:$0xff] }
 0x4bd   : > { %3344 = vmatprep.subr.bf16.mxu0 %v3343_v28  ;;  %v3369_v27 = vpack.c.bf16 %v1750_v26, %v1749_v25 }
 0x4bf   : > { %3085 = vmatmul.mubr.msk.f32.vlgmr.msra.gmra.mrb[8].mxu0 %vm582_vm5, %v1212_v20  ;;  %v1747_v20 = vld [vmem:[#allocation2 + $0x1c0] sm:$0xff] }
 0x4c0   : > { %3346 = vmatpush3.bf16.msra.mxu0 %v3343_v28  ;;  %v3366_v23 = vpack.c.bf16 %v1748_v21, %v1747_v20  ;;  %v1921_v28 = vld [vmem:[#allocation2 + $0x180] sm:$0xff] }
 0x4c1   : > { %3348 = vmatprep.subr.bf16.mxu0 %v3347_v31  ;;  %v3379_v30 = vpack.c.bf16 %v1922_v29, %v1921_v28  ;;  %v2202_v28 = vld [vmem:[#allocation2 + $0x278] sm:$0xff] }
 0x4c4   : > { %3350 = vmatpush3.bf16.msra.mxu0 %v3347_v31  ;;  %v1923_v31 = vld [vmem:[#allocation2 + $0x190] sm:$0xff] }
 0x4c5   : > { %3352 = vmatprep.subr.bf16.mxu0 %v3351_v34  ;;  %v3383_v33 = vpack.c.bf16 %v1924_v32, %v1923_v31  ;;  %v2374_v31 = vld [vmem:[#allocation2 + $0x228] sm:$0xff] }
 0x57c   : > { %v3097_v35 = vpop.f32.mrb[8].mxu1 }
 0x57d   : > { %v1451_v37 = vpop.f32.mrb[9].mxu1 }
 0x58a   : > { %v1290_v39 = vpop.f32.mrb[6].mxu0 }
 0x58b   : > { %v1291_v40 = vadd.f32 %v2769_v38, %v1290_v39  ;;  %v3075_v41 = vpop.f32.mrb[7].mxu0 }
 0x58d   : > { %v1463_v42 = vrot.slane %v1291_v40, %v3879_v36  ;;  %v2780_v40 = vld [vmem:[%s4058_s7 + $0x4] sm:$0x1] }
 0x58f   : > { %v1464_v43 = vadd.f32 %v1463_v42, %v1451_v37  ;;  %v1465_v44 = vadd.f32 %v3097_v35, %v1463_v42  ;;  %v2016_v35 = vld [vmem:[#allocation2 + $0x1a8] sm:$0xff] }
 0x591   : > { %v1466_v47 = vmax.f32 %v1464_v43, 0.0  ;;  %v1467_v48 = vmax.f32 %v1465_v44, 0.0 }
 0x592   : > { %v1368_v49 = vpop.f32.mrb[8].mxu0 }
 0x593   : > { %v3086_v51 = vpop.f32.mrb[9].mxu0  ;;  %3106 = vmatprep.mubr.msk.f32.mxu0 %vm582_vm5, %v1466_v47  ;;  %v1651_v4 = vrot.slane %v1368_v49, %v3879_v36  ;;  %v2017_v47 = vld [vmem:[#allocation2 + $0x1b0] sm:$0xff] }
 0x594   : > { %3107 = vmatmul.mubr.msk.f32.vlgmr.msra.gmra.mrb[10].mxu0 %vm582_vm5, %v1467_v48  ;;  %v2018_v48 = vld [vmem:[#allocation2 + $0x1b8] sm:$0xff] }
 0x595   : > { %3354 = vmatpush3.bf16.msra.mxu0 %v3351_v34  ;;  %3117 = vmatprep.mubr.msk.f32.mxu0 %vm582_vm5, %v3442_v7  ;;  %v2015_v34 = vld [vmem:[#allocation2 + $0x1a0] sm:$0xff]  ;;  %v3391_v52 = vpack.c.bf16 %v2018_v48, %v2017_v47  ;;  %v2469_v48 = vld [vmem:[#allocation2 + $0x250] sm:$0xff] }
 0x596   : > { %3356 = vmatprep.subr.bf16.mxu0 %v3355_v50  ;;  %v3387_v37 = vpack.c.bf16 %v2016_v35, %v2015_v34  ;;  %v2376_v34 = vld [vmem:[#allocation2 + $0x238] sm:$0xff] }
 0x599   : > { %3358 = vmatpush3.bf16.msra.mxu0 %v3355_v50 }
 0x59a   : > { %3372 = vmatprep.subr.bf16.mxu0 %v3371_v54 }
 0x59c   : > { %3118 = vmatmul.mubr.msk.f32.vlgmr.msra.gmra.mrb[10].mxu0 %vm582_vm5, %v3895_v6 }
 0x59d   : > { %3374 = vmatpush3.bf16.msra.mxu0 %v3371_v54  ;;  %v2279_v54 = vld [vmem:[#allocation2 + $0x1e0] sm:$0xff] }
 0x59e   : > { %3376 = vmatprep.subr.bf16.mxu0 %v3375_v57  ;;  %v3407_v56 = vpack.c.bf16 %v2280_v55, %v2279_v54  ;;  %v2570_v55 = vld [vmem:[%s4059_s8] sm:$0xff] }
 0x5a1   : > { %3378 = vmatpush3.bf16.msra.mxu0 %v3375_v57  ;;  %v2281_v57 = vld [vmem:[#allocation2 + $0x1f0] sm:$0xff] }
 0x5a2   : > { %3395 = vmatprep.subr.bf16.mxu0 %v3621_v58  ;;  %v3411_v60 = vpack.c.bf16 %v2282_v59, %v2281_v57  ;;  %v2572_v59 = vld [vmem:[%s4059_s8 + $0x10] sm:$0xff] }
 0x66f   : > { %v3119_v3 = vpop.f32.mrb[10].mxu0 }
 0x670   : > { %v3443_v5 = vadd.f32 %v3119_v3, %v2775_v2  ;;  %v1639_v6 = vpop.f32.mrb[11].mxu0 }
 0x671   : > { %v3445_v7 = vadd.f32 %v2775_v2, %v1639_v6  ;;  %v2122_v2 = vld [vmem:[#allocation2 + $0x218] sm:$0xff] }
 0x672   : > { %v3926_v8 = vadd.f32 %v3443_v5, %v1651_v4  ;;  %v3399_v3 = vpack.c.bf16 %v2122_v2, %v2121_v1 }
 0x673   : > { %v3446_v9 = vadd.f32 %v3445_v7, %v1651_v4  ;;  %v2786_v4 = vld [vmem:[%s4058_s7 + $0x5] ss:$0 sm:$0xff] }
 0x674   : > { %v1657_v10 = vsel %vm582_vm5, %v3926_v8, -inf  ;;  %v1825_v13 = vmax.f32 %v3926_v8, 0.0 }
 0x675   : > { %v1656_v11 = vsel %vm582_vm5, %v3446_v9, -inf  ;;  %v1824_v12 = vmax.f32 %v3446_v9, 0.0 }
 0x676   : > { %v1658_v14 = vmax.f32 %v1656_v11, %v1657_v10 }
 0x677   : > { %3150 = vmatprep.mubr.msk.f32.mxu0 %vm582_vm5, %v1824_v12 }
 0x678   : > { %v1659_v15 = vrot.slane %v1658_v14, 4  ;;  %3151 = vmatmul.mubr.msk.f32.vlgmr.msra.gmra.mrb[12].mxu0 %vm582_vm5, %v1825_v13 }
 0x679   : > { %3183 = vmatprep.mubr.msk.f32.mxu0 %vm3622_vm6, %v3623_v62  ;;  %3397 = vmatpush3.bf16.msra.mxu0 %v3396_v0 }
 0x67a   : > { %v1660_v16 = vmax.f32 %v1658_v14, %v1659_v15  ;;  %3398 = vmatprep.subr.bf16.mxu0 %v3621_v58 }
 0x67c   : > { %v1661_v17 = vrot.slane %v1660_v16, 2 }
 0x67d   : > { %3400 = vmatpush3.bf16.msra.mxu0 %v3399_v3 }
 0x67e   : > { %v1662_v18 = vmax.f32 %v1660_v16, %v1661_v17  ;;  %3401 = vmatprep.subr.bf16.mxu0 %v3621_v58 }
 0x680   : > { %v1663_v19 = vrot.slane %v1662_v18, 1 }
 0x682   : > { %v1664_v22 = vmax.f32 %v1662_v18, %v1663_v19 }
 0x684   : > { %v1665_v24 = vmax.f32 %v1664_v22, 0.0 }
 0x686   : > { %3129 = vmatmul.mubr.msk.f32.vlgmr.msra.gmra.mrb[10].mxu1 %vm582_vm5, %v1665_v24 }
 0x687   : > { %3367 = vmatpush3.bf16.msra.mxu1 %v3366_v23  ;;  %3139 = vmatprep.mubr.msk.f32.mxu1 %vm3622_vm6, %v3623_v62  ;;  %v2200_v23 = vld [vmem:[#allocation2 + $0x268] sm:$0xff] }
 0x688   : > { %3368 = vmatprep.subr.bf16.mxu1 %v3621_v58 }
 0x68b   : > { %3370 = vmatpush3.bf16.msra.mxu1 %v3369_v27  ;;  %v2201_v27 = vld [vmem:[#allocation2 + $0x270] sm:$0xff] }
 0x68c   : > { %3380 = vmatprep.subr.bf16.mxu1 %v3379_v30  ;;  %v3405_v29 = vpack.c.bf16 %v2202_v28, %v2201_v27 }
 0x68e   : > { %3140 = vmatmul.mubr.msk.f32.vlgmr.msra.gmra.mrb[12].mxu1 %vm582_vm5, %v1664_v22  ;;  %v2199_v22 = vld [vmem:[#allocation2 + $0x260] sm:$0xff] }
 0x68f   : > { %3382 = vmatpush3.bf16.msra.mxu1 %v3379_v30  ;;  %v3402_v25 = vpack.c.bf16 %v2200_v23, %v2199_v22  ;;  %v2373_v30 = vld [vmem:[#allocation2 + $0x220] sm:$0xff] }
 0x690   : > { %3384 = vmatprep.subr.bf16.mxu1 %v3383_v33  ;;  %v3415_v32 = vpack.c.bf16 %v2374_v31, %v2373_v30 }
 0x693   : > { %3386 = vmatpush3.bf16.msra.mxu1 %v3383_v33  ;;  %v2375_v33 = vld [vmem:[#allocation2 + $0x230] sm:$0xff] }
 0x694   : > { %3388 = vmatprep.subr.bf16.mxu1 %v3387_v37  ;;  %v3419_v35 = vpack.c.bf16 %v2376_v34, %v2375_v33 }
 0x74b   : > { %v3152_v38 = vpop.f32.mrb[12].mxu0 }
 0x74c   : > { %v1903_v39 = vpop.f32.mrb[13].mxu0 }
 0x759   : > { %v1742_v41 = vpop.f32.mrb[10].mxu1 }
 0x75a   : > { %v1743_v42 = vadd.f32 %v2780_v40, %v1742_v41  ;;  %v3130_v43 = vpop.f32.mrb[11].mxu1  ;;  %v2791_v41 = vld [vmem:[%s4058_s7 + $0x6] sm:$0x1] }
 0x75c   : > { %v1915_v44 = vrot.slane %v1743_v42, %v3879_v36 }
 0x75e   : > { %v1916_v45 = vadd.f32 %v1915_v44, %v1903_v39  ;;  %v1917_v46 = vadd.f32 %v3152_v38, %v1915_v44  ;;  %v2468_v38 = vld [vmem:[#allocation2 + $0x248] sm:$0xff] }
 0x760   : > { %v1918_v49 = vmax.f32 %v1916_v45, 0.0  ;;  %v1919_v50 = vmax.f32 %v1917_v46, 0.0 }
 0x761   : > { %v1820_v51 = vpop.f32.mrb[12].mxu1 }
 0x762   : > { %v3141_v53 = vpop.f32.mrb[13].mxu1  ;;  %3161 = vmatprep.mubr.msk.f32.mxu1 %vm582_vm5, %v1918_v49  ;;  %v2103_v6 = vrot.slane %v1820_v51, %v3879_v36  ;;  %v2470_v49 = vld [vmem:[#allocation2 + $0x258] sm:$0xff] }
 0x763   : > { %3162 = vmatmul.mubr.msk.f32.vlgmr.msra.gmra.mrb[14].mxu1 %vm582_vm5, %v1919_v50  ;;  %v3427_v53 = vpack.c.bf16 %v2470_v49, %v2469_v48 }
 0x764   : > { %3390 = vmatpush3.bf16.msra.mxu1 %v3387_v37  ;;  %3172 = vmatprep.mubr.msk.f32.mxu1 %vm582_vm5, %v3446_v9  ;;  %v2467_v37 = vld [vmem:[#allocation2 + $0x240] sm:$0xff] }
 0x765   : > { %3392 = vmatprep.subr.bf16.mxu1 %v3391_v52  ;;  %v3423_v39 = vpack.c.bf16 %v2468_v38, %v2467_v37 }
 0x768   : > { %3394 = vmatpush3.bf16.msra.mxu1 %v3391_v52 }
 0x769   : > { %3408 = vmatprep.subr.bf16.mxu1 %v3407_v56 }
 0x76b   : > { %3173 = vmatmul.mubr.msk.f32.vlgmr.msra.gmra.mrb[14].mxu1 %vm582_vm5, %v3926_v8 }
 0x76c   : > { %3410 = vmatpush3.bf16.msra.mxu1 %v3407_v56  ;;  %v2571_v56 = vld [vmem:[%s4059_s8 + $0x8] sm:$0xff] }
 0x76d   : > { %3412 = vmatprep.subr.bf16.mxu1 %v3411_v60  ;;  %v3432_v57 = vpack.c.bf16 %v2571_v56, %v2570_v55 }
 0x770   : > { %3414 = vmatpush3.bf16.msra.mxu1 %v3411_v60  ;;  %v2573_v60 = vld [vmem:[%s4059_s8 + $0x18] sm:$0xff] }
 0x771   : > { %3431 = vmatprep.subr.bf16.mxu1 %v3621_v58  ;;  %v3435_v61 = vpack.c.bf16 %v2573_v60, %v2572_v59 }
 0x83e   : > { %v3174_v5 = vpop.f32.mrb[14].mxu1 }
 0x83f   : > { %v3447_v7 = vadd.f32 %v3174_v5, %v2786_v4  ;;  %v2091_v8 = vpop.f32.mrb[15].mxu1 }
 0x840   : > { %v3449_v9 = vadd.f32 %v2786_v4, %v2091_v8 }
 0x841   : > { %v3957_v10 = vadd.f32 %v3447_v7, %v2103_v6 }
 0x842   : > { %v3450_v11 = vadd.f32 %v3449_v9, %v2103_v6 }
 0x843   : > { %v2109_v12 = vsel %vm582_vm5, %v3957_v10, -inf  ;;  %v2277_v15 = vmax.f32 %v3957_v10, 0.0 }
 0x844   : > { %v2108_v13 = vsel %vm582_vm5, %v3450_v11, -inf  ;;  %v2276_v14 = vmax.f32 %v3450_v11, 0.0 }
 0x845   : > { %v2110_v16 = vmax.f32 %v2108_v13, %v2109_v12 }
 0x846   : > { %3205 = vmatprep.mubr.msk.f32.mxu1 %vm582_vm5, %v2276_v14 }
 0x847   : > { %v2111_v17 = vrot.slane %v2110_v16, 4  ;;  %3206 = vmatmul.mubr.msk.f32.vlgmr.msra.gmra.mrb[16].mxu1 %vm582_vm5, %v2277_v15 }
 0x848   : > { %3238 = vmatprep.mubr.msk.f32.mxu1 %vm3622_vm6, %v3623_v62  ;;  %3433 = vmatpush3.bf16.msra.mxu1 %v3432_v57 }
 0x849   : > { %v2112_v18 = vmax.f32 %v2110_v16, %v2111_v17  ;;  %3434 = vmatprep.subr.bf16.mxu1 %v3621_v58 }
 0x84b   : > { %v2113_v19 = vrot.slane %v2112_v18, 2 }
 0x84c   : > { %3436 = vmatpush3.bf16.msra.mxu1 %v3435_v61 }
 0x84d   : > { %v2114_v20 = vmax.f32 %v2112_v18, %v2113_v19 }
 0x84f   : > { %v2115_v21 = vrot.slane %v2114_v20, 1 }
 0x851   : > { %v2116_v24 = vmax.f32 %v2114_v20, %v2115_v21 }
 0x853   : > { %v2117_v26 = vmax.f32 %v2116_v24, 0.0 }
 0x855   : > { %3184 = vmatmul.mubr.msk.f32.vlgmr.msra.gmra.mrb[14].mxu0 %vm582_vm5, %v2117_v26 }
 0x856   : > { %3403 = vmatpush3.bf16.msra.mxu0 %v3402_v25  ;;  %3194 = vmatprep.mubr.msk.f32.mxu0 %vm3622_vm6, %v3623_v62 }
 0x857   : > { %3404 = vmatprep.subr.bf16.mxu0 %v3621_v58 }
 0x85a   : > { %3406 = vmatpush3.bf16.msra.mxu0 %v3405_v29 }
 0x85b   : > { %3416 = vmatprep.subr.bf16.mxu0 %v3415_v32 }
 0x85d   : > { %3195 = vmatmul.mubr.msk.f32.vlgmr.msra.gmra.mrb[16].mxu0 %vm582_vm5, %v2116_v24 }
 0x85e   : > { %3418 = vmatpush3.bf16.msra.mxu0 %v3415_v32 }
 0x85f   : > { %3420 = vmatprep.subr.bf16.mxu0 %v3419_v35 }
 0x862   : > { %3422 = vmatpush3.bf16.msra.mxu0 %v3419_v35 }
 0x863   : > { %3424 = vmatprep.subr.bf16.mxu0 %v3423_v39 }
 0x91a   : > { %v3207_v62 = vpop.f32.mrb[16].mxu1 }
 0x91b   : > { %v2355_v40 = vpop.f32.mrb[17].mxu1 }
 0x928   : > { %v2194_v42 = vpop.f32.mrb[14].mxu0 }
 0x929   : > { %v2195_v43 = vadd.f32 %v2791_v41, %v2194_v42  ;;  %v3185_v44 = vpop.f32.mrb[15].mxu0 }
 0x92b   : > { %v2367_v45 = vrot.slane %v2195_v43, %v3879_v36 }
 0x92d   : > { %v2368_v46 = vadd.f32 %v2367_v45, %v2355_v40  ;;  %v2369_v47 = vadd.f32 %v3207_v62, %v2367_v45 }
 0x92f   : > { %v2370_v50 = vmax.f32 %v2368_v46, 0.0  ;;  %v2371_v51 = vmax.f32 %v2369_v47, 0.0 }
 0x930   : > { %v2272_v52 = vpop.f32.mrb[16].mxu0 }
 0x931   : > { %v3196_v54 = vpop.f32.mrb[17].mxu0  ;;  %3216 = vmatprep.mubr.msk.f32.mxu0 %vm582_vm5, %v2370_v50  ;;  %v2555_v1 = vrot.slane %v2272_v52, %v3879_v36  ;;  %v2574_v36 = vld [vmem:[%s4060_s9] sm:$0x1] }
 0x932   : > { %3217 = vmatmul.mubr.msk.f32.vlgmr.msra.gmra.mrb[18].mxu0 %vm582_vm5, %v2371_v51 }
 0x933   : > { %3426 = vmatpush3.bf16.msra.mxu0 %v3423_v39  ;;  %3227 = vmatprep.mubr.msk.f32.mxu0 %vm582_vm5, %v3450_v11 }
 0x934   : > { %3428 = vmatprep.subr.bf16.mxu0 %v3427_v53 }
 0x937   : > { %3430 = vmatpush3.bf16.msra.mxu0 %v3427_v53 }
 0x93a   : > { %3228 = vmatmul.mubr.msk.f32.vlgmr.msra.gmra.mrb[18].mxu0 %vm582_vm5, %v3957_v10 }
 0xa0d   : > { %v3229_v0 = vpop.f32.mrb[18].mxu0 }
 0xa0e   : > { %v3451_v2 = vadd.f32 %v3229_v0, %v2797_v63  ;;  %v2543_v58 = vpop.f32.mrb[19].mxu0 }
 0xa0f   : > { %v3453_v3 = vadd.f32 %v2797_v63, %v2543_v58 }
 0xa10   : > { %v3452_v4 = vadd.f32 %v3451_v2, %v2555_v1 }
 0xa11   : > { %v3454_v5 = vadd.f32 %v3453_v3, %v2555_v1 }
 0xa12   : > { %v2561_v6 = vsel %vm582_vm5, %v3452_v4, -inf }
 0xa13   : > { %v2560_v7 = vsel %vm582_vm5, %v3454_v5, -inf }
 0xa14   : > { %v2562_v8 = vmax.f32 %v2560_v7, %v2561_v6 }
 0xa16   : > { %v2563_v9 = vrot.slane %v2562_v8, 4 }
 0xa18   : > { %v2564_v10 = vmax.f32 %v2562_v8, %v2563_v9 }
 0xa1a   : > { %v2565_v11 = vrot.slane %v2564_v10, 2 }
 0xa1c   : > { %v2566_v12 = vmax.f32 %v2564_v10, %v2565_v11 }
 0xa1e   : > { %v2567_v13 = vrot.slane %v2566_v12, 1 }
 0xa20   : > { %v2568_v14 = vmax.f32 %v2566_v12, %v2567_v13 }
 0xa22   : > { %v2569_v15 = vmax.f32 %v2568_v14, 0.0 }
 0xa24   : > { %3239 = vmatmul.mubr.msk.f32.vlgmr.msra.gmra.mrb[18].mxu1 %vm582_vm5, %v2569_v15 }
 0xaf7   : > { %v2644_v16 = vpop.f32.mrb[18].mxu1 }
 0xaf8   : > { %v2645_v17 = vadd.f32 %v2644_v16, %v2574_v36  ;;  %v3240_v18 = vpop.f32.mrb[19].mxu1 }
 0xafa   : > { %2649 = vst.msk [vmem:[%s366_s29] sm:$0x1] %vm2648_vm7, %v2645_v17 }
 0xafb   : > { %3562 = shalt.err (!%p3559_p7)
}
 0xafc   : > { %s3563_s21 = scalar_lea.hbm %s4009_s11, 16  ;;  %s3567_s12 = scalar_lea.hbm %s4061_s10, 32 }
 0xafd   : > { %p3564_p8 = scmp.ne.s32.totalorder %s4009_s11, %s3563_s21  ;;  %p3568_p1 = scmp.lt.u32.totalorder %s4009_s11, %s4061_s10 }
 0xafe   : > { %p3569_p0 = scmp.lt.u32.totalorder %s3567_s12, %s3563_s21  ;;  %p3571_p6 = scmp.lt.u32.totalorder %s3563_s21, %s4009_s11 }
 0xaff   : > { %p3565_p11 = pnand %p3564_p8, %p4072_p9 }
 0xb00   : > { %p3570_p5 = por %p3569_p0, %p3568_p1 }
 0xb01   : > { %p3566_p13 = pneg %p3565_p11 }
 0xb02   : > { %p3572_p10 = por %p3571_p6, %p3570_p5 }
 0xb04   : > { %p3573_p12 = pnand %p3572_p10, %p3566_p13 }
 0xb06   : > { %3576 = shalt.err (!%p3573_p12)
}
 0xb07   : > { %3469 = dma.vmem_to_hbm [thread:$0]  (%p4072_p9), %s4011_s30, 16, %s4009_s11, %s2651_s20  }
 0xb08 PF: > { %p3481_p2 = scmp.ge.s32.totalorder %s3615_s16, 2  ;;  %s2675_s28 = sand.u32 1, %s3603_s13  }
 0xb09   : > { %p4073_p3 = scmp.ne.s32.totalorder %s4066_s24, 0  ;;  %s2676_s26 = scalar_lea.sflag [#allocation4], %s2675_s28 }
 0xb0b   : > { %p3476_p4 = pnand %p3481_p2, %p4073_p3 }
 0xb0d   : > { %3598 = dma.done.wait (!%p3476_p4), %s2676_s26, 16  }
 0xb0e   : > { %3600 = vsyncadd (!%p3476_p4), %s2676_s26, 4294967280  ;;  %p21_p7 = scmp.ge.s32.totalorder %s3705_s19, 4   ;;  %s4074_s13 = smov %s3607_s14 }
 0xb0f   : > { %s4075_s14 = smov %s3611_s15  ;;  %s4076_s15 = smov %s3716_s22 }
 0xb10   : > { %s4077_s16 = smov %s3705_s19  ;;  %23 = sbr.rel (!%p21_p7) target bundleno = 4 (0x4), region = 128 }
 0xb17   :  { %2680 = vsyncpa [#allocation3], 1 }
 0xb18   :  { %2682 = vsyncpa [#allocation3 + $0x1], 1 }
 0xb19   :  { %2683 = vsyncpa [#allocation4], 1 }
 0xb1a   :  { %2685 = vsyncpa [#allocation4 + $0x1], 1 }

</bundles_post_ra>
